<compile_context>
chip_gen: v7x
topology: tpu7x:2x2x1
jax: 0.10.0
libtpu: 0.0.40
codegen_flags: <defaults>
</compile_context>

<pallas_src>
import jax
import jax.numpy as jnp
from jax.experimental import pallas as pl
from jax.experimental.pallas import tpu as pltpu

EPS = 1e-5
LRELU_SLOPE = 0.2


def _vmem_limit_bytes():
    try:
        cap = int(pltpu.get_tpu_info().vmem_capacity_bytes)
    except Exception:
        cap = 64 * 1024 * 1024
    return cap * 3 // 4


def _pick_cout_tile(cout, target=128):
    """Largest divisor of Cout <= target that keeps sublane alignment (mult of 8)."""
    if cout <= target:
        return cout
    for t in range(target, 7, -1):
        if cout % t == 0 and t % 8 == 0:
            return t
    return cout


def _make_conv_kernel(tap_offsets, p_full, use_norm, activation, has_bias, inv_count):
    """One grid step: accumulate taps as (Cout_t,Cin')@(Cin',P) [+bias] [+IN] [+act]."""

    def kernel(*refs):
        it = iter(refs)
        x_ref = next(it)                          # (1, Cin', L)       bf16
        w_ref = next(it)                          # (T, Cout_t, Cin')  bf16
        b_ref = next(it) if has_bias else None    # (Cout_t, 1)        f32
        m_ref = next(it) if use_norm else None    # (1, P)             f32
        o_ref = next(it)                          # (1, Cout_t, P)

        # Fused im2col: MXU matmuls over statically shifted, lane-dense views of the
        # flattened input plane, f32 accumulation.
        acc = None
        for t, off in enumerate(tap_offsets):
            rhs = x_ref[0, :, pl.ds(off, p_full)]                    # (Cin', P) bf16
            part = jnp.dot(w_ref[t], rhs, preferred_element_type=jnp.float32)
            acc = part if acc is None else acc + part                # (Cout_t, P) f32

        y = acc
        if has_bias:
            y = y + b_ref[...]                                       # (Cout_t,1) broadcast

        if use_norm:
            # InstanceNorm2d(affine=False) over VALID spatial positions only; the mask
            # zeroes the garbage columns introduced by the flattened-tap formulation.
            m = m_ref[...]                                           # (1, P)
            mean = jnp.sum(y * m, axis=-1, keepdims=True) * inv_count
            d = (y - mean) * m
            var = jnp.sum(d * d, axis=-1, keepdims=True) * inv_count
            y = (y - mean) * jax.lax.rsqrt(var + EPS)

        if activation == "lrelu":
            y = jnp.maximum(y, LRELU_SLOPE * y)
        # "no_act": identity

        o_ref[0] = y.astype(o_ref.dtype)

    return kernel


def conv_block(x, weight, bias, *, stride, padding=1, use_norm, activation,
               out_dtype=jnp.bfloat16):
    """x: (N,Cin,H,W); weight: (Cout,Cin,K,K) (PyTorch Conv2d layout); bias: (Cout,)."""
    N, Cin, H, W = x.shape
    Cout, Cin_w, K, _ = weight.shape
    assert Cin == Cin_w and K % stride == 0

    Hout = (H + 2 * padding - K) // stride + 1
    Wout = (W + 2 * padding - K) // stride + 1
    Kq = K // stride                      # taps per axis after space-to-depth
    Cin2 = Cin * stride * stride

    # ---- glue (~1x activation bytes): pad + space-to-depth + flatten; NO im2col ----
    hp0, wp0 = H + 2 * padding, W + 2 * padding
    eh, ew = (-hp0) % stride, (-wp0) % stride
    x_pad = jnp.pad(x, ((0, 0), (0, 0), (padding, padding + eh), (padding, padding + ew)))
    Hh, Wh = (hp0 + eh) // stride, (wp0 + ew) // stride
    L = Hh * Wh
    x_sd = (x_pad.reshape(N, Cin, Hh, stride, Wh, stride)
                 .transpose(0, 3, 5, 1, 2, 4)
                 .reshape(N, Cin2, L)
                 .astype(jnp.bfloat16))

    # weights -> (taps, Cout, Cin2), channel order matching the space-to-depth layout
    w2 = (weight.reshape(Cout, Cin, Kq, stride, Kq, stride)
                .transpose(2, 4, 0, 3, 5, 1)
                .reshape(Kq * Kq, Cout, Cin2)
                .astype(jnp.bfloat16))
    tap_offsets = tuple(qh * Wh + qw for qh in range(Kq) for qw in range(Kq))

    # flattened output length; positions with (p % Wh) >= Wout are garbage columns
    P_full = (Hout - 1) * Wh + Wout

    # Bias is a no-op before InstanceNorm (per-channel mean subtraction) -> drop it there.
    has_bias = (not use_norm) and (bias is not None)

    ct = _pick_cout_tile(Cout)
    n_ct = Cout // ct

    in_specs = [
        pl.BlockSpec((1, Cin2, L), lambda n, j: (n, 0, 0)),
        pl.BlockSpec((Kq * Kq, ct, Cin2), lambda n, j: (0, j, 0)),
    ]
    args = [x_sd, w2]
    if has_bias:
        in_specs.append(pl.BlockSpec((ct, 1), lambda n, j: (j, 0)))
        args.append(bias.reshape(Cout, 1).astype(jnp.float32))
    if use_norm:
        valid = (jnp.arange(P_full) % Wh < Wout).astype(jnp.float32).reshape(1, P_full)
        in_specs.append(pl.BlockSpec((1, P_full), lambda n, j: (0, 0)))
        args.append(valid)

    kernel = _make_conv_kernel(tap_offsets, P_full, use_norm, activation, has_bias,
                               1.0 / float(Hout * Wout))

    # TODO(synk): for very large resolutions add an "arbitrary" grid axis over P tiles with
    # streamed InstanceNorm statistics (sum/sumsq scratch + pl.when finalize) so per-step
    # VMEM stays bounded on v7x's 64 MiB; at CycleGAN-scale shapes full-P blocks fit.
    out = pl.pallas_call(
        kernel,
        out_shape=jax.ShapeDtypeStruct((N, Cout, P_full), out_dtype),
        grid_spec=pltpu.PrefetchScalarGridSpec(
            num_scalar_prefetch=0,
            grid=(N, n_ct),
            in_specs=in_specs,
            out_specs=pl.BlockSpec((1, ct, P_full), lambda n, j: (n, j, 0)),
        ),
        compiler_params=pltpu.CompilerParams(
            dimension_semantics=("parallel", "parallel"),
            vmem_limit_bytes=_vmem_limit_bytes(),
        ),
    )(*args)

    # Drop the garbage columns: pad to a full (Hout, Wh) raster, then slice.  XLA fuses
    # this with the next layer's pad/space-to-depth copy (no transpose, ~1x act bytes).
    out = jnp.pad(out, ((0, 0), (0, 0), (0, Hout * Wh - P_full)))
    return out.reshape(N, Cout, Hout, Wh)[:, :, :, :Wout]


def discriminator_forward(x, params):
    """params: list of 5 (weight, bias) tuples in PyTorch Conv2d layout (Cout, Cin, K, K)."""
    (w1, b1), (w2, b2), (w3, b3), (w4, b4), (w5, b5) = params
    h = conv_block(x, w1, b1, stride=2, use_norm=False, activation="lrelu")   # conv1
    h = conv_block(h, w2, b2, stride=2, use_norm=True,  activation="lrelu")   # conv2
    h = conv_block(h, w3, b3, stride=2, use_norm=True,  activation="lrelu")   # conv3
    h = conv_block(h, w4, b4, stride=1, use_norm=True,  activation="lrelu")   # conv4
    # TODO(synk): Cout=1 leaves the MXU nearly empty; a VPU reduction (or fusing this
    # projection into conv4's epilogue) would remove the wasted MXU passes.
    h = conv_block(h, w5, b5, stride=1, use_norm=False, activation="no_act",
                   out_dtype=jnp.float32)                                     # conv5
    return h


if __name__ == "__main__":
    key = jax.random.PRNGKey(0)
    N, input_dim, num_filter, output_dim, S = 2, 3, 4, 1, 32
    K = 4

    keys = jax.random.split(key, 11)

    def make_params(kw, kb, cin, cout):
        w = 0.02 * jax.random.normal(kw, (cout, cin, K, K), dtype=jnp.float32)
        b = 0.02 * jax.random.normal(kb, (cout,), dtype=jnp.float32)
        return w, b

    params = [
        make_params(keys[0], keys[1], input_dim, num_filter),
        make_params(keys[2], keys[3], num_filter, num_filter * 2),
        make_params(keys[4], keys[5], num_filter * 2, num_filter * 4),
        make_params(keys[6], keys[7], num_filter * 4, num_filter * 8),
        make_params(keys[8], keys[9], num_filter * 8, output_dim),
    ]
    x = jax.random.normal(keys[10], (N, input_dim, S, S), dtype=jnp.float32)

    y = jax.jit(discriminator_forward)(x, params)
    jax.block_until_ready(y)

    # spatial: 32 -> 16 -> 8 -> 4 -> 3 -> 2
    assert y.shape == (N, output_dim, 2, 2), y.shape
    assert bool(jnp.all(jnp.isfinite(y))), "non-finite output"
    print("KERNEL_OK")
</pallas_src>

<mosaic_0001>
module attributes {stable_mosaic.version = 11 : i64} {
  func.func @kernel(%arg0: i32, %arg1: i32, %arg2: memref<1x12x289xbf16, #tpu.memory_space<vmem>>, %arg3: memref<4x4x12xbf16, #tpu.memory_space<vmem>>, %arg4: memref<4x1xf32, #tpu.memory_space<vmem>>, %arg5: memref<1x4x271xbf16, #tpu.memory_space<vmem>>) attributes {dimension_semantics = [#tpu.dimension_semantics<parallel>, #tpu.dimension_semantics<parallel>], iteration_bounds = array<i64: 2, 1>, scalar_prefetch = 0 : i64, scratch_operands = 0 : i64, tpu.core_type = #tpu.core_type<tc>, window_params = [{transform_indices = @transform_0, window_bounds = array<i64: 1, 12, 289>}, {transform_indices = @transform_1, window_bounds = array<i64: 4, 4, 12>}, {transform_indices = @transform_2, window_bounds = array<i64: 4, 1>}, {transform_indices = @transform_3, window_bounds = array<i64: 1, 4, 271>}]} {
    %c0 = arith.constant 0 : index
    %c0_0 = arith.constant 0 : index
    %c0_1 = arith.constant 0 : index
    %0 = vector.load %arg2[%c0, %c0_0, %c0_1] : memref<1x12x289xbf16, #tpu.memory_space<vmem>>, vector<1x12x271xbf16>
    %1 = vector.shape_cast %0 : vector<1x12x271xbf16> to vector<12x271xbf16>
    %c0_2 = arith.constant 0 : index
    %c0_3 = arith.constant 0 : index
    %c0_4 = arith.constant 0 : index
    %2 = vector.load %arg3[%c0_2, %c0_3, %c0_4] : memref<4x4x12xbf16, #tpu.memory_space<vmem>>, vector<1x4x12xbf16>
    %3 = vector.shape_cast %2 : vector<1x4x12xbf16> to vector<4x12xbf16>
    %cst = arith.constant dense<0.000000e+00> : vector<4x271xf32>
    %4 = tpu.matmul %3, %1, %cst {dimension_numbers = #tpu.dot_dimension_numbers<[1], [0], [0], [1], [0, 0, 1, 1], [], []>} : vector<4x12xbf16>, vector<12x271xbf16>, vector<4x271xf32> -> vector<4x271xf32>
    %c0_5 = arith.constant 0 : index
    %c0_6 = arith.constant 0 : index
    %c1 = arith.constant 1 : index
    %5 = vector.load %arg2[%c0_5, %c0_6, %c1] : memref<1x12x289xbf16, #tpu.memory_space<vmem>>, vector<1x12x271xbf16>
    %6 = vector.shape_cast %5 : vector<1x12x271xbf16> to vector<12x271xbf16>
    %c1_7 = arith.constant 1 : index
    %c0_8 = arith.constant 0 : index
    %c0_9 = arith.constant 0 : index
    %7 = vector.load %arg3[%c1_7, %c0_8, %c0_9] : memref<4x4x12xbf16, #tpu.memory_space<vmem>>, vector<1x4x12xbf16>
    %8 = vector.shape_cast %7 : vector<1x4x12xbf16> to vector<4x12xbf16>
    %cst_10 = arith.constant dense<0.000000e+00> : vector<4x271xf32>
    %9 = tpu.matmul %8, %6, %cst_10 {dimension_numbers = #tpu.dot_dimension_numbers<[1], [0], [0], [1], [0, 0, 1, 1], [], []>} : vector<4x12xbf16>, vector<12x271xbf16>, vector<4x271xf32> -> vector<4x271xf32>
    %10 = arith.addf %4, %9 : vector<4x271xf32>
    %c0_11 = arith.constant 0 : index
    %c0_12 = arith.constant 0 : index
    %c17 = arith.constant 17 : index
    %11 = vector.load %arg2[%c0_11, %c0_12, %c17] : memref<1x12x289xbf16, #tpu.memory_space<vmem>>, vector<1x12x271xbf16>
    %12 = vector.shape_cast %11 : vector<1x12x271xbf16> to vector<12x271xbf16>
    %c2 = arith.constant 2 : index
    %c0_13 = arith.constant 0 : index
    %c0_14 = arith.constant 0 : index
    %13 = vector.load %arg3[%c2, %c0_13, %c0_14] : memref<4x4x12xbf16, #tpu.memory_space<vmem>>, vector<1x4x12xbf16>
    %14 = vector.shape_cast %13 : vector<1x4x12xbf16> to vector<4x12xbf16>
    %cst_15 = arith.constant dense<0.000000e+00> : vector<4x271xf32>
    %15 = tpu.matmul %14, %12, %cst_15 {dimension_numbers = #tpu.dot_dimension_numbers<[1], [0], [0], [1], [0, 0, 1, 1], [], []>} : vector<4x12xbf16>, vector<12x271xbf16>, vector<4x271xf32> -> vector<4x271xf32>
    %16 = arith.addf %10, %15 : vector<4x271xf32>
    %c0_16 = arith.constant 0 : index
    %c0_17 = arith.constant 0 : index
    %c18 = arith.constant 18 : index
    %17 = vector.load %arg2[%c0_16, %c0_17, %c18] : memref<1x12x289xbf16, #tpu.memory_space<vmem>>, vector<1x12x271xbf16>
    %18 = vector.shape_cast %17 : vector<1x12x271xbf16> to vector<12x271xbf16>
    %c3 = arith.constant 3 : index
    %c0_18 = arith.constant 0 : index
    %c0_19 = arith.constant 0 : index
    %19 = vector.load %arg3[%c3, %c0_18, %c0_19] : memref<4x4x12xbf16, #tpu.memory_space<vmem>>, vector<1x4x12xbf16>
    %20 = vector.shape_cast %19 : vector<1x4x12xbf16> to vector<4x12xbf16>
    %cst_20 = arith.constant dense<0.000000e+00> : vector<4x271xf32>
    %21 = tpu.matmul %20, %18, %cst_20 {dimension_numbers = #tpu.dot_dimension_numbers<[1], [0], [0], [1], [0, 0, 1, 1], [], []>} : vector<4x12xbf16>, vector<12x271xbf16>, vector<4x271xf32> -> vector<4x271xf32>
    %22 = arith.addf %16, %21 : vector<4x271xf32>
    %c0_21 = arith.constant 0 : index
    %c0_22 = arith.constant 0 : index
    %23 = vector.load %arg4[%c0_21, %c0_22] : memref<4x1xf32, #tpu.memory_space<vmem>>, vector<4x1xf32>
    %24 = vector.broadcast %23 : vector<4x1xf32> to vector<4x271xf32>
    %25 = arith.addf %22, %24 : vector<4x271xf32>
    %cst_23 = arith.constant 2.000000e-01 : f32
    %26 = vector.broadcast %cst_23 : f32 to vector<4x271xf32>
    %27 = arith.mulf %26, %25 : vector<4x271xf32>
    %28 = arith.maximumf %25, %27 : vector<4x271xf32>
    %29 = arith.truncf %28 : vector<4x271xf32> to vector<4x271xbf16>
    %c0_24 = arith.constant 0 : index
    %c0_25 = arith.constant 0 : index
    %c0_26 = arith.constant 0 : index
    %30 = vector.load %arg5[%c0_24, %c0_25, %c0_26] : memref<1x4x271xbf16, #tpu.memory_space<vmem>>, vector<1x4x271xbf16>
    %31 = vector.shape_cast %30 : vector<1x4x271xbf16> to vector<4x271xbf16>
    %32 = vector.shape_cast %29 : vector<4x271xbf16> to vector<1x4x271xbf16>
    tpu.vector_store %arg5[%c0_24, %c0_25, %c0_26], %32 {strides = array<i32>} : memref<1x4x271xbf16, #tpu.memory_space<vmem>>, vector<1x4x271xbf16>,
    return
  }
  func.func @transform_0(%arg0: i32, %arg1: i32) -> (i32, i32, i32) {
    %c0_i32 = arith.constant 0 : i32
    %c0_i32_0 = arith.constant 0 : i32
    %c0_i32_1 = arith.constant 0 : i32
    return %arg0, %c0_i32, %c0_i32_0 : i32, i32, i32
  }
  func.func @transform_1(%arg0: i32, %arg1: i32) -> (i32, i32, i32) {
    %c0_i32 = arith.constant 0 : i32
    %c0_i32_0 = arith.constant 0 : i32
    %c0_i32_1 = arith.constant 0 : i32
    return %c0_i32, %arg1, %c0_i32_0 : i32, i32, i32
  }
  func.func @transform_2(%arg0: i32, %arg1: i32) -> (i32, i32) {
    %c0_i32 = arith.constant 0 : i32
    %c0_i32_0 = arith.constant 0 : i32
    return %arg1, %c0_i32 : i32, i32
  }
  func.func @transform_3(%arg0: i32, %arg1: i32) -> (i32, i32, i32) {
    %c0_i32 = arith.constant 0 : i32
    %c0_i32_0 = arith.constant 0 : i32
    return %arg0, %arg1, %c0_i32 : i32, i32, i32
  }
}

module attributes {stable_mosaic.version = 11 : i64} {
  func.func @kernel(%arg0: i32, %arg1: i32, %arg2: memref<1x16x81xbf16, #tpu.memory_space<vmem>>, %arg3: memref<4x8x16xbf16, #tpu.memory_space<vmem>>, %arg4: memref<1x71xf32, #tpu.memory_space<vmem>>, %arg5: memref<1x8x71xbf16, #tpu.memory_space<vmem>>) attributes {dimension_semantics = [#tpu.dimension_semantics<parallel>, #tpu.dimension_semantics<parallel>], iteration_bounds = array<i64: 2, 1>, scalar_prefetch = 0 : i64, scratch_operands = 0 : i64, tpu.core_type = #tpu.core_type<tc>, window_params = [{transform_indices = @transform_0, window_bounds = array<i64: 1, 16, 81>}, {transform_indices = @transform_1, window_bounds = array<i64: 4, 8, 16>}, {pipeline_mode = #tpu.pipeline_mode<synchronous>, transform_indices = @transform_2, window_bounds = array<i64: 1, 71>}, {transform_indices = @transform_3, window_bounds = array<i64: 1, 8, 71>}]} {
    %c0 = arith.constant 0 : index
    %c0_0 = arith.constant 0 : index
    %c0_1 = arith.constant 0 : index
    %0 = vector.load %arg2[%c0, %c0_0, %c0_1] : memref<1x16x81xbf16, #tpu.memory_space<vmem>>, vector<1x16x71xbf16>
    %1 = vector.shape_cast %0 : vector<1x16x71xbf16> to vector<16x71xbf16>
    %c0_2 = arith.constant 0 : index
    %c0_3 = arith.constant 0 : index
    %c0_4 = arith.constant 0 : index
    %2 = vector.load %arg3[%c0_2, %c0_3, %c0_4] : memref<4x8x16xbf16, #tpu.memory_space<vmem>>, vector<1x8x16xbf16>
    %3 = vector.shape_cast %2 : vector<1x8x16xbf16> to vector<8x16xbf16>
    %cst = arith.constant dense<0.000000e+00> : vector<8x71xf32>
    %4 = tpu.matmul %3, %1, %cst {dimension_numbers = #tpu.dot_dimension_numbers<[1], [0], [0], [1], [0, 0, 1, 1], [], []>} : vector<8x16xbf16>, vector<16x71xbf16>, vector<8x71xf32> -> vector<8x71xf32>
    %c0_5 = arith.constant 0 : index
    %c0_6 = arith.constant 0 : index
    %c1 = arith.constant 1 : index
    %5 = vector.load %arg2[%c0_5, %c0_6, %c1] : memref<1x16x81xbf16, #tpu.memory_space<vmem>>, vector<1x16x71xbf16>
    %6 = vector.shape_cast %5 : vector<1x16x71xbf16> to vector<16x71xbf16>
    %c1_7 = arith.constant 1 : index
    %c0_8 = arith.constant 0 : index
    %c0_9 = arith.constant 0 : index
    %7 = vector.load %arg3[%c1_7, %c0_8, %c0_9] : memref<4x8x16xbf16, #tpu.memory_space<vmem>>, vector<1x8x16xbf16>
    %8 = vector.shape_cast %7 : vector<1x8x16xbf16> to vector<8x16xbf16>
    %cst_10 = arith.constant dense<0.000000e+00> : vector<8x71xf32>
    %9 = tpu.matmul %8, %6, %cst_10 {dimension_numbers = #tpu.dot_dimension_numbers<[1], [0], [0], [1], [0, 0, 1, 1], [], []>} : vector<8x16xbf16>, vector<16x71xbf16>, vector<8x71xf32> -> vector<8x71xf32>
    %10 = arith.addf %4, %9 : vector<8x71xf32>
    %c0_11 = arith.constant 0 : index
    %c0_12 = arith.constant 0 : index
    %c9 = arith.constant 9 : index
    %11 = vector.load %arg2[%c0_11, %c0_12, %c9] : memref<1x16x81xbf16, #tpu.memory_space<vmem>>, vector<1x16x71xbf16>
    %12 = vector.shape_cast %11 : vector<1x16x71xbf16> to vector<16x71xbf16>
    %c2 = arith.constant 2 : index
    %c0_13 = arith.constant 0 : index
    %c0_14 = arith.constant 0 : index
    %13 = vector.load %arg3[%c2, %c0_13, %c0_14] : memref<4x8x16xbf16, #tpu.memory_space<vmem>>, vector<1x8x16xbf16>
    %14 = vector.shape_cast %13 : vector<1x8x16xbf16> to vector<8x16xbf16>
    %cst_15 = arith.constant dense<0.000000e+00> : vector<8x71xf32>
    %15 = tpu.matmul %14, %12, %cst_15 {dimension_numbers = #tpu.dot_dimension_numbers<[1], [0], [0], [1], [0, 0, 1, 1], [], []>} : vector<8x16xbf16>, vector<16x71xbf16>, vector<8x71xf32> -> vector<8x71xf32>
    %16 = arith.addf %10, %15 : vector<8x71xf32>
    %c0_16 = arith.constant 0 : index
    %c0_17 = arith.constant 0 : index
    %c10 = arith.constant 10 : index
    %17 = vector.load %arg2[%c0_16, %c0_17, %c10] : memref<1x16x81xbf16, #tpu.memory_space<vmem>>, vector<1x16x71xbf16>
    %18 = vector.shape_cast %17 : vector<1x16x71xbf16> to vector<16x71xbf16>
    %c3 = arith.constant 3 : index
    %c0_18 = arith.constant 0 : index
    %c0_19 = arith.constant 0 : index
    %19 = vector.load %arg3[%c3, %c0_18, %c0_19] : memref<4x8x16xbf16, #tpu.memory_space<vmem>>, vector<1x8x16xbf16>
    %20 = vector.shape_cast %19 : vector<1x8x16xbf16> to vector<8x16xbf16>
    %cst_20 = arith.constant dense<0.000000e+00> : vector<8x71xf32>
    %21 = tpu.matmul %20, %18, %cst_20 {dimension_numbers = #tpu.dot_dimension_numbers<[1], [0], [0], [1], [0, 0, 1, 1], [], []>} : vector<8x16xbf16>, vector<16x71xbf16>, vector<8x71xf32> -> vector<8x71xf32>
    %22 = arith.addf %16, %21 : vector<8x71xf32>
    %c0_21 = arith.constant 0 : index
    %c0_22 = arith.constant 0 : index
    %23 = vector.load %arg4[%c0_21, %c0_22] : memref<1x71xf32, #tpu.memory_space<vmem>>, vector<1x71xf32>
    %24 = vector.broadcast %23 : vector<1x71xf32> to vector<8x71xf32>
    %25 = arith.mulf %22, %24 : vector<8x71xf32>
    %cst_23 = arith.constant dense<0.000000e+00> : vector<8xf32>
    %26 = vector.multi_reduction <add>, %25, %cst_23 [1] : vector<8x71xf32> to vector<8xf32>
    %27 = vector.shape_cast %26 : vector<8xf32> to vector<8x1xf32>
    %cst_24 = arith.constant 1.562500e-02 : f32
    %28 = vector.broadcast %cst_24 : f32 to vector<8x1xf32>
    %29 = arith.mulf %27, %28 : vector<8x1xf32>
    %30 = vector.broadcast %29 : vector<8x1xf32> to vector<8x71xf32>
    %31 = arith.subf %22, %30 : vector<8x71xf32>
    %32 = vector.broadcast %23 : vector<1x71xf32> to vector<8x71xf32>
    %33 = arith.mulf %31, %32 : vector<8x71xf32>
    %34 = arith.mulf %33, %33 : vector<8x71xf32>
    %cst_25 = arith.constant dense<0.000000e+00> : vector<8xf32>
    %35 = vector.multi_reduction <add>, %34, %cst_25 [1] : vector<8x71xf32> to vector<8xf32>
    %36 = vector.shape_cast %35 : vector<8xf32> to vector<8x1xf32>
    %cst_26 = arith.constant 1.562500e-02 : f32
    %37 = vector.broadcast %cst_26 : f32 to vector<8x1xf32>
    %38 = arith.mulf %36, %37 : vector<8x1xf32>
    %39 = vector.broadcast %29 : vector<8x1xf32> to vector<8x71xf32>
    %40 = arith.subf %22, %39 : vector<8x71xf32>
    %cst_27 = arith.constant 9.99999974E-6 : f32
    %41 = vector.broadcast %cst_27 : f32 to vector<8x1xf32>
    %42 = arith.addf %38, %41 : vector<8x1xf32>
    %43 = math.rsqrt %42 : vector<8x1xf32>
    %44 = vector.broadcast %43 : vector<8x1xf32> to vector<8x71xf32>
    %45 = arith.mulf %40, %44 : vector<8x71xf32>
    %cst_28 = arith.constant 2.000000e-01 : f32
    %46 = vector.broadcast %cst_28 : f32 to vector<8x71xf32>
    %47 = arith.mulf %46, %45 : vector<8x71xf32>
    %48 = arith.maximumf %45, %47 : vector<8x71xf32>
    %49 = arith.truncf %48 : vector<8x71xf32> to vector<8x71xbf16>
    %c0_29 = arith.constant 0 : index
    %c0_30 = arith.constant 0 : index
    %c0_31 = arith.constant 0 : index
    %50 = vector.load %arg5[%c0_29, %c0_30, %c0_31] : memref<1x8x71xbf16, #tpu.memory_space<vmem>>, vector<1x8x71xbf16>
    %51 = vector.shape_cast %50 : vector<1x8x71xbf16> to vector<8x71xbf16>
    %52 = vector.shape_cast %49 : vector<8x71xbf16> to vector<1x8x71xbf16>
    tpu.vector_store %arg5[%c0_29, %c0_30, %c0_31], %52 {strides = array<i32>} : memref<1x8x71xbf16, #tpu.memory_space<vmem>>, vector<1x8x71xbf16>,
    return
  }
  func.func @transform_0(%arg0: i32, %arg1: i32) -> (i32, i32, i32) {
    %c0_i32 = arith.constant 0 : i32
    %c0_i32_0 = arith.constant 0 : i32
    %c0_i32_1 = arith.constant 0 : i32
    return %arg0, %c0_i32, %c0_i32_0 : i32, i32, i32
  }
  func.func @transform_1(%arg0: i32, %arg1: i32) -> (i32, i32, i32) {
    %c0_i32 = arith.constant 0 : i32
    %c0_i32_0 = arith.constant 0 : i32
    %c0_i32_1 = arith.constant 0 : i32
    return %c0_i32, %arg1, %c0_i32_0 : i32, i32, i32
  }
  func.func @transform_2(%arg0: i32, %arg1: i32) -> (i32, i32) {
    %c0_i32 = arith.constant 0 : i32
    %c0_i32_0 = arith.constant 0 : i32
    %c0_i32_1 = arith.constant 0 : i32
    return %c0_i32, %c0_i32_0 : i32, i32
  }
  func.func @transform_3(%arg0: i32, %arg1: i32) -> (i32, i32, i32) {
    %c0_i32 = arith.constant 0 : i32
    %c0_i32_0 = arith.constant 0 : i32
    return %arg0, %arg1, %c0_i32 : i32, i32, i32
  }
}

module attributes {stable_mosaic.version = 11 : i64} {
  func.func @kernel(%arg0: i32, %arg1: i32, %arg2: memref<1x32x25xbf16, #tpu.memory_space<vmem>>, %arg3: memref<4x16x32xbf16, #tpu.memory_space<vmem>>, %arg4: memref<1x19xf32, #tpu.memory_space<vmem>>, %arg5: memref<1x16x19xbf16, #tpu.memory_space<vmem>>) attributes {dimension_semantics = [#tpu.dimension_semantics<parallel>, #tpu.dimension_semantics<parallel>], iteration_bounds = array<i64: 2, 1>, scalar_prefetch = 0 : i64, scratch_operands = 0 : i64, tpu.core_type = #tpu.core_type<tc>, window_params = [{transform_indices = @transform_0, window_bounds = array<i64: 1, 32, 25>}, {transform_indices = @transform_1, window_bounds = array<i64: 4, 16, 32>}, {pipeline_mode = #tpu.pipeline_mode<synchronous>, transform_indices = @transform_2, window_bounds = array<i64: 1, 19>}, {transform_indices = @transform_3, window_bounds = array<i64: 1, 16, 19>}]} {
    %c0 = arith.constant 0 : index
    %c0_0 = arith.constant 0 : index
    %c0_1 = arith.constant 0 : index
    %0 = vector.load %arg2[%c0, %c0_0, %c0_1] : memref<1x32x25xbf16, #tpu.memory_space<vmem>>, vector<1x32x19xbf16>
    %1 = vector.shape_cast %0 : vector<1x32x19xbf16> to vector<32x19xbf16>
    %c0_2 = arith.constant 0 : index
    %c0_3 = arith.constant 0 : index
    %c0_4 = arith.constant 0 : index
    %2 = vector.load %arg3[%c0_2, %c0_3, %c0_4] : memref<4x16x32xbf16, #tpu.memory_space<vmem>>, vector<1x16x32xbf16>
    %3 = vector.shape_cast %2 : vector<1x16x32xbf16> to vector<16x32xbf16>
    %cst = arith.constant dense<0.000000e+00> : vector<16x19xf32>
    %4 = tpu.matmul %3, %1, %cst {dimension_numbers = #tpu.dot_dimension_numbers<[1], [0], [0], [1], [0, 0, 1, 1], [], []>} : vector<16x32xbf16>, vector<32x19xbf16>, vector<16x19xf32> -> vector<16x19xf32>
    %c0_5 = arith.constant 0 : index
    %c0_6 = arith.constant 0 : index
    %c1 = arith.constant 1 : index
    %5 = vector.load %arg2[%c0_5, %c0_6, %c1] : memref<1x32x25xbf16, #tpu.memory_space<vmem>>, vector<1x32x19xbf16>
    %6 = vector.shape_cast %5 : vector<1x32x19xbf16> to vector<32x19xbf16>
    %c1_7 = arith.constant 1 : index
    %c0_8 = arith.constant 0 : index
    %c0_9 = arith.constant 0 : index
    %7 = vector.load %arg3[%c1_7, %c0_8, %c0_9] : memref<4x16x32xbf16, #tpu.memory_space<vmem>>, vector<1x16x32xbf16>
    %8 = vector.shape_cast %7 : vector<1x16x32xbf16> to vector<16x32xbf16>
    %cst_10 = arith.constant dense<0.000000e+00> : vector<16x19xf32>
    %9 = tpu.matmul %8, %6, %cst_10 {dimension_numbers = #tpu.dot_dimension_numbers<[1], [0], [0], [1], [0, 0, 1, 1], [], []>} : vector<16x32xbf16>, vector<32x19xbf16>, vector<16x19xf32> -> vector<16x19xf32>
    %10 = arith.addf %4, %9 : vector<16x19xf32>
    %c0_11 = arith.constant 0 : index
    %c0_12 = arith.constant 0 : index
    %c5 = arith.constant 5 : index
    %11 = vector.load %arg2[%c0_11, %c0_12, %c5] : memref<1x32x25xbf16, #tpu.memory_space<vmem>>, vector<1x32x19xbf16>
    %12 = vector.shape_cast %11 : vector<1x32x19xbf16> to vector<32x19xbf16>
    %c2 = arith.constant 2 : index
    %c0_13 = arith.constant 0 : index
    %c0_14 = arith.constant 0 : index
    %13 = vector.load %arg3[%c2, %c0_13, %c0_14] : memref<4x16x32xbf16, #tpu.memory_space<vmem>>, vector<1x16x32xbf16>
    %14 = vector.shape_cast %13 : vector<1x16x32xbf16> to vector<16x32xbf16>
    %cst_15 = arith.constant dense<0.000000e+00> : vector<16x19xf32>
    %15 = tpu.matmul %14, %12, %cst_15 {dimension_numbers = #tpu.dot_dimension_numbers<[1], [0], [0], [1], [0, 0, 1, 1], [], []>} : vector<16x32xbf16>, vector<32x19xbf16>, vector<16x19xf32> -> vector<16x19xf32>
    %16 = arith.addf %10, %15 : vector<16x19xf32>
    %c0_16 = arith.constant 0 : index
    %c0_17 = arith.constant 0 : index
    %c6 = arith.constant 6 : index
    %17 = vector.load %arg2[%c0_16, %c0_17, %c6] : memref<1x32x25xbf16, #tpu.memory_space<vmem>>, vector<1x32x19xbf16>
    %18 = vector.shape_cast %17 : vector<1x32x19xbf16> to vector<32x19xbf16>
    %c3 = arith.constant 3 : index
    %c0_18 = arith.constant 0 : index
    %c0_19 = arith.constant 0 : index
    %19 = vector.load %arg3[%c3, %c0_18, %c0_19] : memref<4x16x32xbf16, #tpu.memory_space<vmem>>, vector<1x16x32xbf16>
    %20 = vector.shape_cast %19 : vector<1x16x32xbf16> to vector<16x32xbf16>
    %cst_20 = arith.constant dense<0.000000e+00> : vector<16x19xf32>
    %21 = tpu.matmul %20, %18, %cst_20 {dimension_numbers = #tpu.dot_dimension_numbers<[1], [0], [0], [1], [0, 0, 1, 1], [], []>} : vector<16x32xbf16>, vector<32x19xbf16>, vector<16x19xf32> -> vector<16x19xf32>
    %22 = arith.addf %16, %21 : vector<16x19xf32>
    %c0_21 = arith.constant 0 : index
    %c0_22 = arith.constant 0 : index
    %23 = vector.load %arg4[%c0_21, %c0_22] : memref<1x19xf32, #tpu.memory_space<vmem>>, vector<1x19xf32>
    %24 = vector.broadcast %23 : vector<1x19xf32> to vector<16x19xf32>
    %25 = arith.mulf %22, %24 : vector<16x19xf32>
    %cst_23 = arith.constant dense<0.000000e+00> : vector<16xf32>
    %26 = vector.multi_reduction <add>, %25, %cst_23 [1] : vector<16x19xf32> to vector<16xf32>
    %27 = vector.shape_cast %26 : vector<16xf32> to vector<16x1xf32>
    %cst_24 = arith.constant 6.250000e-02 : f32
    %28 = vector.broadcast %cst_24 : f32 to vector<16x1xf32>
    %29 = arith.mulf %27, %28 : vector<16x1xf32>
    %30 = vector.broadcast %29 : vector<16x1xf32> to vector<16x19xf32>
    %31 = arith.subf %22, %30 : vector<16x19xf32>
    %32 = vector.broadcast %23 : vector<1x19xf32> to vector<16x19xf32>
    %33 = arith.mulf %31, %32 : vector<16x19xf32>
    %34 = arith.mulf %33, %33 : vector<16x19xf32>
    %cst_25 = arith.constant dense<0.000000e+00> : vector<16xf32>
    %35 = vector.multi_reduction <add>, %34, %cst_25 [1] : vector<16x19xf32> to vector<16xf32>
    %36 = vector.shape_cast %35 : vector<16xf32> to vector<16x1xf32>
    %cst_26 = arith.constant 6.250000e-02 : f32
    %37 = vector.broadcast %cst_26 : f32 to vector<16x1xf32>
    %38 = arith.mulf %36, %37 : vector<16x1xf32>
    %39 = vector.broadcast %29 : vector<16x1xf32> to vector<16x19xf32>
    %40 = arith.subf %22, %39 : vector<16x19xf32>
    %cst_27 = arith.constant 9.99999974E-6 : f32
    %41 = vector.broadcast %cst_27 : f32 to vector<16x1xf32>
    %42 = arith.addf %38, %41 : vector<16x1xf32>
    %43 = math.rsqrt %42 : vector<16x1xf32>
    %44 = vector.broadcast %43 : vector<16x1xf32> to vector<16x19xf32>
    %45 = arith.mulf %40, %44 : vector<16x19xf32>
    %cst_28 = arith.constant 2.000000e-01 : f32
    %46 = vector.broadcast %cst_28 : f32 to vector<16x19xf32>
    %47 = arith.mulf %46, %45 : vector<16x19xf32>
    %48 = arith.maximumf %45, %47 : vector<16x19xf32>
    %49 = arith.truncf %48 : vector<16x19xf32> to vector<16x19xbf16>
    %c0_29 = arith.constant 0 : index
    %c0_30 = arith.constant 0 : index
    %c0_31 = arith.constant 0 : index
    %50 = vector.load %arg5[%c0_29, %c0_30, %c0_31] : memref<1x16x19xbf16, #tpu.memory_space<vmem>>, vector<1x16x19xbf16>
    %51 = vector.shape_cast %50 : vector<1x16x19xbf16> to vector<16x19xbf16>
    %52 = vector.shape_cast %49 : vector<16x19xbf16> to vector<1x16x19xbf16>
    tpu.vector_store %arg5[%c0_29, %c0_30, %c0_31], %52 {strides = array<i32>} : memref<1x16x19xbf16, #tpu.memory_space<vmem>>, vector<1x16x19xbf16>,
    return
  }
  func.func @transform_0(%arg0: i32, %arg1: i32) -> (i32, i32, i32) {
    %c0_i32 = arith.constant 0 : i32
    %c0_i32_0 = arith.constant 0 : i32
    %c0_i32_1 = arith.constant 0 : i32
    return %arg0, %c0_i32, %c0_i32_0 : i32, i32, i32
  }
  func.func @transform_1(%arg0: i32, %arg1: i32) -> (i32, i32, i32) {
    %c0_i32 = arith.constant 0 : i32
    %c0_i32_0 = arith.constant 0 : i32
    %c0_i32_1 = arith.constant 0 : i32
    return %c0_i32, %arg1, %c0_i32_0 : i32, i32, i32
  }
  func.func @transform_2(%arg0: i32, %arg1: i32) -> (i32, i32) {
    %c0_i32 = arith.constant 0 : i32
    %c0_i32_0 = arith.constant 0 : i32
    %c0_i32_1 = arith.constant 0 : i32
    return %c0_i32, %c0_i32_0 : i32, i32
  }
  func.func @transform_3(%arg0: i32, %arg1: i32) -> (i32, i32, i32) {
    %c0_i32 = arith.constant 0 : i32
    %c0_i32_0 = arith.constant 0 : i32
    return %arg0, %arg1, %c0_i32 : i32, i32, i32
  }
}

module attributes {stable_mosaic.version = 11 : i64} {
  func.func @kernel(%arg0: i32, %arg1: i32, %arg2: memref<1x16x36xbf16, #tpu.memory_space<vmem>>, %arg3: memref<16x32x16xbf16, #tpu.memory_space<vmem>>, %arg4: memref<1x15xf32, #tpu.memory_space<vmem>>, %arg5: memref<1x32x15xbf16, #tpu.memory_space<vmem>>) attributes {dimension_semantics = [#tpu.dimension_semantics<parallel>, #tpu.dimension_semantics<parallel>], iteration_bounds = array<i64: 2, 1>, scalar_prefetch = 0 : i64, scratch_operands = 0 : i64, tpu.core_type = #tpu.core_type<tc>, window_params = [{transform_indices = @transform_0, window_bounds = array<i64: 1, 16, 36>}, {transform_indices = @transform_1, window_bounds = array<i64: 16, 32, 16>}, {pipeline_mode = #tpu.pipeline_mode<synchronous>, transform_indices = @transform_2, window_bounds = array<i64: 1, 15>}, {transform_indices = @transform_3, window_bounds = array<i64: 1, 32, 15>}]} {
    %c0 = arith.constant 0 : index
    %c0_0 = arith.constant 0 : index
    %c0_1 = arith.constant 0 : index
    %0 = vector.load %arg2[%c0, %c0_0, %c0_1] : memref<1x16x36xbf16, #tpu.memory_space<vmem>>, vector<1x16x15xbf16>
    %1 = vector.shape_cast %0 : vector<1x16x15xbf16> to vector<16x15xbf16>
    %c0_2 = arith.constant 0 : index
    %c0_3 = arith.constant 0 : index
    %c0_4 = arith.constant 0 : index
    %2 = vector.load %arg3[%c0_2, %c0_3, %c0_4] : memref<16x32x16xbf16, #tpu.memory_space<vmem>>, vector<1x32x16xbf16>
    %3 = vector.shape_cast %2 : vector<1x32x16xbf16> to vector<32x16xbf16>
    %cst = arith.constant dense<0.000000e+00> : vector<32x15xf32>
    %4 = tpu.matmul %3, %1, %cst {dimension_numbers = #tpu.dot_dimension_numbers<[1], [0], [0], [1], [0, 0, 1, 1], [], []>} : vector<32x16xbf16>, vector<16x15xbf16>, vector<32x15xf32> -> vector<32x15xf32>
    %c0_5 = arith.constant 0 : index
    %c0_6 = arith.constant 0 : index
    %c1 = arith.constant 1 : index
    %5 = vector.load %arg2[%c0_5, %c0_6, %c1] : memref<1x16x36xbf16, #tpu.memory_space<vmem>>, vector<1x16x15xbf16>
    %6 = vector.shape_cast %5 : vector<1x16x15xbf16> to vector<16x15xbf16>
    %c1_7 = arith.constant 1 : index
    %c0_8 = arith.constant 0 : index
    %c0_9 = arith.constant 0 : index
    %7 = vector.load %arg3[%c1_7, %c0_8, %c0_9] : memref<16x32x16xbf16, #tpu.memory_space<vmem>>, vector<1x32x16xbf16>
    %8 = vector.shape_cast %7 : vector<1x32x16xbf16> to vector<32x16xbf16>
    %cst_10 = arith.constant dense<0.000000e+00> : vector<32x15xf32>
    %9 = tpu.matmul %8, %6, %cst_10 {dimension_numbers = #tpu.dot_dimension_numbers<[1], [0], [0], [1], [0, 0, 1, 1], [], []>} : vector<32x16xbf16>, vector<16x15xbf16>, vector<32x15xf32> -> vector<32x15xf32>
    %10 = arith.addf %4, %9 : vector<32x15xf32>
    %c0_11 = arith.constant 0 : index
    %c0_12 = arith.constant 0 : index
    %c2 = arith.constant 2 : index
    %11 = vector.load %arg2[%c0_11, %c0_12, %c2] : memref<1x16x36xbf16, #tpu.memory_space<vmem>>, vector<1x16x15xbf16>
    %12 = vector.shape_cast %11 : vector<1x16x15xbf16> to vector<16x15xbf16>
    %c2_13 = arith.constant 2 : index
    %c0_14 = arith.constant 0 : index
    %c0_15 = arith.constant 0 : index
    %13 = vector.load %arg3[%c2_13, %c0_14, %c0_15] : memref<16x32x16xbf16, #tpu.memory_space<vmem>>, vector<1x32x16xbf16>
    %14 = vector.shape_cast %13 : vector<1x32x16xbf16> to vector<32x16xbf16>
    %cst_16 = arith.constant dense<0.000000e+00> : vector<32x15xf32>
    %15 = tpu.matmul %14, %12, %cst_16 {dimension_numbers = #tpu.dot_dimension_numbers<[1], [0], [0], [1], [0, 0, 1, 1], [], []>} : vector<32x16xbf16>, vector<16x15xbf16>, vector<32x15xf32> -> vector<32x15xf32>
    %16 = arith.addf %10, %15 : vector<32x15xf32>
    %c0_17 = arith.constant 0 : index
    %c0_18 = arith.constant 0 : index
    %c3 = arith.constant 3 : index
    %17 = vector.load %arg2[%c0_17, %c0_18, %c3] : memref<1x16x36xbf16, #tpu.memory_space<vmem>>, vector<1x16x15xbf16>
    %18 = vector.shape_cast %17 : vector<1x16x15xbf16> to vector<16x15xbf16>
    %c3_19 = arith.constant 3 : index
    %c0_20 = arith.constant 0 : index
    %c0_21 = arith.constant 0 : index
    %19 = vector.load %arg3[%c3_19, %c0_20, %c0_21] : memref<16x32x16xbf16, #tpu.memory_space<vmem>>, vector<1x32x16xbf16>
    %20 = vector.shape_cast %19 : vector<1x32x16xbf16> to vector<32x16xbf16>
    %cst_22 = arith.constant dense<0.000000e+00> : vector<32x15xf32>
    %21 = tpu.matmul %20, %18, %cst_22 {dimension_numbers = #tpu.dot_dimension_numbers<[1], [0], [0], [1], [0, 0, 1, 1], [], []>} : vector<32x16xbf16>, vector<16x15xbf16>, vector<32x15xf32> -> vector<32x15xf32>
    %22 = arith.addf %16, %21 : vector<32x15xf32>
    %c0_23 = arith.constant 0 : index
    %c0_24 = arith.constant 0 : index
    %c6 = arith.constant 6 : index
    %23 = vector.load %arg2[%c0_23, %c0_24, %c6] : memref<1x16x36xbf16, #tpu.memory_space<vmem>>, vector<1x16x15xbf16>
    %24 = vector.shape_cast %23 : vector<1x16x15xbf16> to vector<16x15xbf16>
    %c4 = arith.constant 4 : index
    %c0_25 = arith.constant 0 : index
    %c0_26 = arith.constant 0 : index
    %25 = vector.load %arg3[%c4, %c0_25, %c0_26] : memref<16x32x16xbf16, #tpu.memory_space<vmem>>, vector<1x32x16xbf16>
    %26 = vector.shape_cast %25 : vector<1x32x16xbf16> to vector<32x16xbf16>
    %cst_27 = arith.constant dense<0.000000e+00> : vector<32x15xf32>
    %27 = tpu.matmul %26, %24, %cst_27 {dimension_numbers = #tpu.dot_dimension_numbers<[1], [0], [0], [1], [0, 0, 1, 1], [], []>} : vector<32x16xbf16>, vector<16x15xbf16>, vector<32x15xf32> -> vector<32x15xf32>
    %28 = arith.addf %22, %27 : vector<32x15xf32>
    %c0_28 = arith.constant 0 : index
    %c0_29 = arith.constant 0 : index
    %c7 = arith.constant 7 : index
    %29 = vector.load %arg2[%c0_28, %c0_29, %c7] : memref<1x16x36xbf16, #tpu.memory_space<vmem>>, vector<1x16x15xbf16>
    %30 = vector.shape_cast %29 : vector<1x16x15xbf16> to vector<16x15xbf16>
    %c5 = arith.constant 5 : index
    %c0_30 = arith.constant 0 : index
    %c0_31 = arith.constant 0 : index
    %31 = vector.load %arg3[%c5, %c0_30, %c0_31] : memref<16x32x16xbf16, #tpu.memory_space<vmem>>, vector<1x32x16xbf16>
    %32 = vector.shape_cast %31 : vector<1x32x16xbf16> to vector<32x16xbf16>
    %cst_32 = arith.constant dense<0.000000e+00> : vector<32x15xf32>
    %33 = tpu.matmul %32, %30, %cst_32 {dimension_numbers = #tpu.dot_dimension_numbers<[1], [0], [0], [1], [0, 0, 1, 1], [], []>} : vector<32x16xbf16>, vector<16x15xbf16>, vector<32x15xf32> -> vector<32x15xf32>
    %34 = arith.addf %28, %33 : vector<32x15xf32>
    %c0_33 = arith.constant 0 : index
    %c0_34 = arith.constant 0 : index
    %c8 = arith.constant 8 : index
    %35 = vector.load %arg2[%c0_33, %c0_34, %c8] : memref<1x16x36xbf16, #tpu.memory_space<vmem>>, vector<1x16x15xbf16>
    %36 = vector.shape_cast %35 : vector<1x16x15xbf16> to vector<16x15xbf16>
    %c6_35 = arith.constant 6 : index
    %c0_36 = arith.constant 0 : index
    %c0_37 = arith.constant 0 : index
    %37 = vector.load %arg3[%c6_35, %c0_36, %c0_37] : memref<16x32x16xbf16, #tpu.memory_space<vmem>>, vector<1x32x16xbf16>
    %38 = vector.shape_cast %37 : vector<1x32x16xbf16> to vector<32x16xbf16>
    %cst_38 = arith.constant dense<0.000000e+00> : vector<32x15xf32>
    %39 = tpu.matmul %38, %36, %cst_38 {dimension_numbers = #tpu.dot_dimension_numbers<[1], [0], [0], [1], [0, 0, 1, 1], [], []>} : vector<32x16xbf16>, vector<16x15xbf16>, vector<32x15xf32> -> vector<32x15xf32>
    %40 = arith.addf %34, %39 : vector<32x15xf32>
    %c0_39 = arith.constant 0 : index
    %c0_40 = arith.constant 0 : index
    %c9 = arith.constant 9 : index
    %41 = vector.load %arg2[%c0_39, %c0_40, %c9] : memref<1x16x36xbf16, #tpu.memory_space<vmem>>, vector<1x16x15xbf16>
    %42 = vector.shape_cast %41 : vector<1x16x15xbf16> to vector<16x15xbf16>
    %c7_41 = arith.constant 7 : index
    %c0_42 = arith.constant 0 : index
    %c0_43 = arith.constant 0 : index
    %43 = vector.load %arg3[%c7_41, %c0_42, %c0_43] : memref<16x32x16xbf16, #tpu.memory_space<vmem>>, vector<1x32x16xbf16>
    %44 = vector.shape_cast %43 : vector<1x32x16xbf16> to vector<32x16xbf16>
    %cst_44 = arith.constant dense<0.000000e+00> : vector<32x15xf32>
    %45 = tpu.matmul %44, %42, %cst_44 {dimension_numbers = #tpu.dot_dimension_numbers<[1], [0], [0], [1], [0, 0, 1, 1], [], []>} : vector<32x16xbf16>, vector<16x15xbf16>, vector<32x15xf32> -> vector<32x15xf32>
    %46 = arith.addf %40, %45 : vector<32x15xf32>
    %c0_45 = arith.constant 0 : index
    %c0_46 = arith.constant 0 : index
    %c12 = arith.constant 12 : index
    %47 = vector.load %arg2[%c0_45, %c0_46, %c12] : memref<1x16x36xbf16, #tpu.memory_space<vmem>>, vector<1x16x15xbf16>
    %48 = vector.shape_cast %47 : vector<1x16x15xbf16> to vector<16x15xbf16>
    %c8_47 = arith.constant 8 : index
    %c0_48 = arith.constant 0 : index
    %c0_49 = arith.constant 0 : index
    %49 = vector.load %arg3[%c8_47, %c0_48, %c0_49] : memref<16x32x16xbf16, #tpu.memory_space<vmem>>, vector<1x32x16xbf16>
    %50 = vector.shape_cast %49 : vector<1x32x16xbf16> to vector<32x16xbf16>
    %cst_50 = arith.constant dense<0.000000e+00> : vector<32x15xf32>
    %51 = tpu.matmul %50, %48, %cst_50 {dimension_numbers = #tpu.dot_dimension_numbers<[1], [0], [0], [1], [0, 0, 1, 1], [], []>} : vector<32x16xbf16>, vector<16x15xbf16>, vector<32x15xf32> -> vector<32x15xf32>
    %52 = arith.addf %46, %51 : vector<32x15xf32>
    %c0_51 = arith.constant 0 : index
    %c0_52 = arith.constant 0 : index
    %c13 = arith.constant 13 : index
    %53 = vector.load %arg2[%c0_51, %c0_52, %c13] : memref<1x16x36xbf16, #tpu.memory_space<vmem>>, vector<1x16x15xbf16>
    %54 = vector.shape_cast %53 : vector<1x16x15xbf16> to vector<16x15xbf16>
    %c9_53 = arith.constant 9 : index
    %c0_54 = arith.constant 0 : index
    %c0_55 = arith.constant 0 : index
    %55 = vector.load %arg3[%c9_53, %c0_54, %c0_55] : memref<16x32x16xbf16, #tpu.memory_space<vmem>>, vector<1x32x16xbf16>
    %56 = vector.shape_cast %55 : vector<1x32x16xbf16> to vector<32x16xbf16>
    %cst_56 = arith.constant dense<0.000000e+00> : vector<32x15xf32>
    %57 = tpu.matmul %56, %54, %cst_56 {dimension_numbers = #tpu.dot_dimension_numbers<[1], [0], [0], [1], [0, 0, 1, 1], [], []>} : vector<32x16xbf16>, vector<16x15xbf16>, vector<32x15xf32> -> vector<32x15xf32>
    %58 = arith.addf %52, %57 : vector<32x15xf32>
    %c0_57 = arith.constant 0 : index
    %c0_58 = arith.constant 0 : index
    %c14 = arith.constant 14 : index
    %59 = vector.load %arg2[%c0_57, %c0_58, %c14] : memref<1x16x36xbf16, #tpu.memory_space<vmem>>, vector<1x16x15xbf16>
    %60 = vector.shape_cast %59 : vector<1x16x15xbf16> to vector<16x15xbf16>
    %c10 = arith.constant 10 : index
    %c0_59 = arith.constant 0 : index
    %c0_60 = arith.constant 0 : index
    %61 = vector.load %arg3[%c10, %c0_59, %c0_60] : memref<16x32x16xbf16, #tpu.memory_space<vmem>>, vector<1x32x16xbf16>
    %62 = vector.shape_cast %61 : vector<1x32x16xbf16> to vector<32x16xbf16>
    %cst_61 = arith.constant dense<0.000000e+00> : vector<32x15xf32>
    %63 = tpu.matmul %62, %60, %cst_61 {dimension_numbers = #tpu.dot_dimension_numbers<[1], [0], [0], [1], [0, 0, 1, 1], [], []>} : vector<32x16xbf16>, vector<16x15xbf16>, vector<32x15xf32> -> vector<32x15xf32>
    %64 = arith.addf %58, %63 : vector<32x15xf32>
    %c0_62 = arith.constant 0 : index
    %c0_63 = arith.constant 0 : index
    %c15 = arith.constant 15 : index
    %65 = vector.load %arg2[%c0_62, %c0_63, %c15] : memref<1x16x36xbf16, #tpu.memory_space<vmem>>, vector<1x16x15xbf16>
    %66 = vector.shape_cast %65 : vector<1x16x15xbf16> to vector<16x15xbf16>
    %c11 = arith.constant 11 : index
    %c0_64 = arith.constant 0 : index
    %c0_65 = arith.constant 0 : index
    %67 = vector.load %arg3[%c11, %c0_64, %c0_65] : memref<16x32x16xbf16, #tpu.memory_space<vmem>>, vector<1x32x16xbf16>
    %68 = vector.shape_cast %67 : vector<1x32x16xbf16> to vector<32x16xbf16>
    %cst_66 = arith.constant dense<0.000000e+00> : vector<32x15xf32>
    %69 = tpu.matmul %68, %66, %cst_66 {dimension_numbers = #tpu.dot_dimension_numbers<[1], [0], [0], [1], [0, 0, 1, 1], [], []>} : vector<32x16xbf16>, vector<16x15xbf16>, vector<32x15xf32> -> vector<32x15xf32>
    %70 = arith.addf %64, %69 : vector<32x15xf32>
    %c0_67 = arith.constant 0 : index
    %c0_68 = arith.constant 0 : index
    %c18 = arith.constant 18 : index
    %71 = vector.load %arg2[%c0_67, %c0_68, %c18] : memref<1x16x36xbf16, #tpu.memory_space<vmem>>, vector<1x16x15xbf16>
    %72 = vector.shape_cast %71 : vector<1x16x15xbf16> to vector<16x15xbf16>
    %c12_69 = arith.constant 12 : index
    %c0_70 = arith.constant 0 : index
    %c0_71 = arith.constant 0 : index
    %73 = vector.load %arg3[%c12_69, %c0_70, %c0_71] : memref<16x32x16xbf16, #tpu.memory_space<vmem>>, vector<1x32x16xbf16>
    %74 = vector.shape_cast %73 : vector<1x32x16xbf16> to vector<32x16xbf16>
    %cst_72 = arith.constant dense<0.000000e+00> : vector<32x15xf32>
    %75 = tpu.matmul %74, %72, %cst_72 {dimension_numbers = #tpu.dot_dimension_numbers<[1], [0], [0], [1], [0, 0, 1, 1], [], []>} : vector<32x16xbf16>, vector<16x15xbf16>, vector<32x15xf32> -> vector<32x15xf32>
    %76 = arith.addf %70, %75 : vector<32x15xf32>
    %c0_73 = arith.constant 0 : index
    %c0_74 = arith.constant 0 : index
    %c19 = arith.constant 19 : index
    %77 = vector.load %arg2[%c0_73, %c0_74, %c19] : memref<1x16x36xbf16, #tpu.memory_space<vmem>>, vector<1x16x15xbf16>
    %78 = vector.shape_cast %77 : vector<1x16x15xbf16> to vector<16x15xbf16>
    %c13_75 = arith.constant 13 : index
    %c0_76 = arith.constant 0 : index
    %c0_77 = arith.constant 0 : index
    %79 = vector.load %arg3[%c13_75, %c0_76, %c0_77] : memref<16x32x16xbf16, #tpu.memory_space<vmem>>, vector<1x32x16xbf16>
    %80 = vector.shape_cast %79 : vector<1x32x16xbf16> to vector<32x16xbf16>
    %cst_78 = arith.constant dense<0.000000e+00> : vector<32x15xf32>
    %81 = tpu.matmul %80, %78, %cst_78 {dimension_numbers = #tpu.dot_dimension_numbers<[1], [0], [0], [1], [0, 0, 1, 1], [], []>} : vector<32x16xbf16>, vector<16x15xbf16>, vector<32x15xf32> -> vector<32x15xf32>
    %82 = arith.addf %76, %81 : vector<32x15xf32>
    %c0_79 = arith.constant 0 : index
    %c0_80 = arith.constant 0 : index
    %c20 = arith.constant 20 : index
    %83 = vector.load %arg2[%c0_79, %c0_80, %c20] : memref<1x16x36xbf16, #tpu.memory_space<vmem>>, vector<1x16x15xbf16>
    %84 = vector.shape_cast %83 : vector<1x16x15xbf16> to vector<16x15xbf16>
    %c14_81 = arith.constant 14 : index
    %c0_82 = arith.constant 0 : index
    %c0_83 = arith.constant 0 : index
    %85 = vector.load %arg3[%c14_81, %c0_82, %c0_83] : memref<16x32x16xbf16, #tpu.memory_space<vmem>>, vector<1x32x16xbf16>
    %86 = vector.shape_cast %85 : vector<1x32x16xbf16> to vector<32x16xbf16>
    %cst_84 = arith.constant dense<0.000000e+00> : vector<32x15xf32>
    %87 = tpu.matmul %86, %84, %cst_84 {dimension_numbers = #tpu.dot_dimension_numbers<[1], [0], [0], [1], [0, 0, 1, 1], [], []>} : vector<32x16xbf16>, vector<16x15xbf16>, vector<32x15xf32> -> vector<32x15xf32>
    %88 = arith.addf %82, %87 : vector<32x15xf32>
    %c0_85 = arith.constant 0 : index
    %c0_86 = arith.constant 0 : index
    %c21 = arith.constant 21 : index
    %89 = vector.load %arg2[%c0_85, %c0_86, %c21] : memref<1x16x36xbf16, #tpu.memory_space<vmem>>, vector<1x16x15xbf16>
    %90 = vector.shape_cast %89 : vector<1x16x15xbf16> to vector<16x15xbf16>
    %c15_87 = arith.constant 15 : index
    %c0_88 = arith.constant 0 : index
    %c0_89 = arith.constant 0 : index
    %91 = vector.load %arg3[%c15_87, %c0_88, %c0_89] : memref<16x32x16xbf16, #tpu.memory_space<vmem>>, vector<1x32x16xbf16>
    %92 = vector.shape_cast %91 : vector<1x32x16xbf16> to vector<32x16xbf16>
    %cst_90 = arith.constant dense<0.000000e+00> : vector<32x15xf32>
    %93 = tpu.matmul %92, %90, %cst_90 {dimension_numbers = #tpu.dot_dimension_numbers<[1], [0], [0], [1], [0, 0, 1, 1], [], []>} : vector<32x16xbf16>, vector<16x15xbf16>, vector<32x15xf32> -> vector<32x15xf32>
    %94 = arith.addf %88, %93 : vector<32x15xf32>
    %c0_91 = arith.constant 0 : index
    %c0_92 = arith.constant 0 : index
    %95 = vector.load %arg4[%c0_91, %c0_92] : memref<1x15xf32, #tpu.memory_space<vmem>>, vector<1x15xf32>
    %96 = vector.broadcast %95 : vector<1x15xf32> to vector<32x15xf32>
    %97 = arith.mulf %94, %96 : vector<32x15xf32>
    %cst_93 = arith.constant dense<0.000000e+00> : vector<32xf32>
    %98 = vector.multi_reduction <add>, %97, %cst_93 [1] : vector<32x15xf32> to vector<32xf32>
    %99 = vector.shape_cast %98 : vector<32xf32> to vector<32x1xf32>
    %cst_94 = arith.constant 0.111111112 : f32
    %100 = vector.broadcast %cst_94 : f32 to vector<32x1xf32>
    %101 = arith.mulf %99, %100 : vector<32x1xf32>
    %102 = vector.broadcast %101 : vector<32x1xf32> to vector<32x15xf32>
    %103 = arith.subf %94, %102 : vector<32x15xf32>
    %104 = vector.broadcast %95 : vector<1x15xf32> to vector<32x15xf32>
    %105 = arith.mulf %103, %104 : vector<32x15xf32>
    %106 = arith.mulf %105, %105 : vector<32x15xf32>
    %cst_95 = arith.constant dense<0.000000e+00> : vector<32xf32>
    %107 = vector.multi_reduction <add>, %106, %cst_95 [1] : vector<32x15xf32> to vector<32xf32>
    %108 = vector.shape_cast %107 : vector<32xf32> to vector<32x1xf32>
    %cst_96 = arith.constant 0.111111112 : f32
    %109 = vector.broadcast %cst_96 : f32 to vector<32x1xf32>
    %110 = arith.mulf %108, %109 : vector<32x1xf32>
    %111 = vector.broadcast %101 : vector<32x1xf32> to vector<32x15xf32>
    %112 = arith.subf %94, %111 : vector<32x15xf32>
    %cst_97 = arith.constant 9.99999974E-6 : f32
    %113 = vector.broadcast %cst_97 : f32 to vector<32x1xf32>
    %114 = arith.addf %110, %113 : vector<32x1xf32>
    %115 = math.rsqrt %114 : vector<32x1xf32>
    %116 = vector.broadcast %115 : vector<32x1xf32> to vector<32x15xf32>
    %117 = arith.mulf %112, %116 : vector<32x15xf32>
    %cst_98 = arith.constant 2.000000e-01 : f32
    %118 = vector.broadcast %cst_98 : f32 to vector<32x15xf32>
    %119 = arith.mulf %118, %117 : vector<32x15xf32>
    %120 = arith.maximumf %117, %119 : vector<32x15xf32>
    %121 = arith.truncf %120 : vector<32x15xf32> to vector<32x15xbf16>
    %c0_99 = arith.constant 0 : index
    %c0_100 = arith.constant 0 : index
    %c0_101 = arith.constant 0 : index
    %122 = vector.load %arg5[%c0_99, %c0_100, %c0_101] : memref<1x32x15xbf16, #tpu.memory_space<vmem>>, vector<1x32x15xbf16>
    %123 = vector.shape_cast %122 : vector<1x32x15xbf16> to vector<32x15xbf16>
    %124 = vector.shape_cast %121 : vector<32x15xbf16> to vector<1x32x15xbf16>
    tpu.vector_store %arg5[%c0_99, %c0_100, %c0_101], %124 {strides = array<i32>} : memref<1x32x15xbf16, #tpu.memory_space<vmem>>, vector<1x32x15xbf16>,
    return
  }
  func.func @transform_0(%arg0: i32, %arg1: i32) -> (i32, i32, i32) {
    %c0_i32 = arith.constant 0 : i32
    %c0_i32_0 = arith.constant 0 : i32
    %c0_i32_1 = arith.constant 0 : i32
    return %arg0, %c0_i32, %c0_i32_0 : i32, i32, i32
  }
  func.func @transform_1(%arg0: i32, %arg1: i32) -> (i32, i32, i32) {
    %c0_i32 = arith.constant 0 : i32
    %c0_i32_0 = arith.constant 0 : i32
    %c0_i32_1 = arith.constant 0 : i32
    return %c0_i32, %arg1, %c0_i32_0 : i32, i32, i32
  }
  func.func @transform_2(%arg0: i32, %arg1: i32) -> (i32, i32) {
    %c0_i32 = arith.constant 0 : i32
    %c0_i32_0 = arith.constant 0 : i32
    %c0_i32_1 = arith.constant 0 : i32
    return %c0_i32, %c0_i32_0 : i32, i32
  }
  func.func @transform_3(%arg0: i32, %arg1: i32) -> (i32, i32, i32) {
    %c0_i32 = arith.constant 0 : i32
    %c0_i32_0 = arith.constant 0 : i32
    return %arg0, %arg1, %c0_i32 : i32, i32, i32
  }
}

module attributes {stable_mosaic.version = 11 : i64} {
  func.func @kernel(%arg0: i32, %arg1: i32, %arg2: memref<1x32x25xbf16, #tpu.memory_space<vmem>>, %arg3: memref<16x1x32xbf16, #tpu.memory_space<vmem>>, %arg4: memref<1x1xf32, #tpu.memory_space<vmem>>, %arg5: memref<1x1x7xf32, #tpu.memory_space<vmem>>) attributes {dimension_semantics = [#tpu.dimension_semantics<parallel>, #tpu.dimension_semantics<parallel>], iteration_bounds = array<i64: 2, 1>, scalar_prefetch = 0 : i64, scratch_operands = 0 : i64, tpu.core_type = #tpu.core_type<tc>, window_params = [{transform_indices = @transform_0, window_bounds = array<i64: 1, 32, 25>}, {transform_indices = @transform_1, window_bounds = array<i64: 16, 1, 32>}, {transform_indices = @transform_2, window_bounds = array<i64: 1, 1>}, {transform_indices = @transform_3, window_bounds = array<i64: 1, 1, 7>}]} {
    %c0 = arith.constant 0 : index
    %c0_0 = arith.constant 0 : index
    %c0_1 = arith.constant 0 : index
    %0 = vector.load %arg2[%c0, %c0_0, %c0_1] : memref<1x32x25xbf16, #tpu.memory_space<vmem>>, vector<1x32x7xbf16>
    %1 = vector.shape_cast %0 : vector<1x32x7xbf16> to vector<32x7xbf16>
    %c0_2 = arith.constant 0 : index
    %c0_3 = arith.constant 0 : index
    %c0_4 = arith.constant 0 : index
    %2 = vector.load %arg3[%c0_2, %c0_3, %c0_4] : memref<16x1x32xbf16, #tpu.memory_space<vmem>>, vector<1x1x32xbf16>
    %3 = vector.shape_cast %2 : vector<1x1x32xbf16> to vector<1x32xbf16>
    %cst = arith.constant dense<0.000000e+00> : vector<1x7xf32>
    %4 = tpu.matmul %3, %1, %cst {dimension_numbers = #tpu.dot_dimension_numbers<[1], [0], [0], [1], [0, 0, 1, 1], [], []>} : vector<1x32xbf16>, vector<32x7xbf16>, vector<1x7xf32> -> vector<1x7xf32>
    %c0_5 = arith.constant 0 : index
    %c0_6 = arith.constant 0 : index
    %c1 = arith.constant 1 : index
    %5 = vector.load %arg2[%c0_5, %c0_6, %c1] : memref<1x32x25xbf16, #tpu.memory_space<vmem>>, vector<1x32x7xbf16>
    %6 = vector.shape_cast %5 : vector<1x32x7xbf16> to vector<32x7xbf16>
    %c1_7 = arith.constant 1 : index
    %c0_8 = arith.constant 0 : index
    %c0_9 = arith.constant 0 : index
    %7 = vector.load %arg3[%c1_7, %c0_8, %c0_9] : memref<16x1x32xbf16, #tpu.memory_space<vmem>>, vector<1x1x32xbf16>
    %8 = vector.shape_cast %7 : vector<1x1x32xbf16> to vector<1x32xbf16>
    %cst_10 = arith.constant dense<0.000000e+00> : vector<1x7xf32>
    %9 = tpu.matmul %8, %6, %cst_10 {dimension_numbers = #tpu.dot_dimension_numbers<[1], [0], [0], [1], [0, 0, 1, 1], [], []>} : vector<1x32xbf16>, vector<32x7xbf16>, vector<1x7xf32> -> vector<1x7xf32>
    %10 = arith.addf %4, %9 : vector<1x7xf32>
    %c0_11 = arith.constant 0 : index
    %c0_12 = arith.constant 0 : index
    %c2 = arith.constant 2 : index
    %11 = vector.load %arg2[%c0_11, %c0_12, %c2] : memref<1x32x25xbf16, #tpu.memory_space<vmem>>, vector<1x32x7xbf16>
    %12 = vector.shape_cast %11 : vector<1x32x7xbf16> to vector<32x7xbf16>
    %c2_13 = arith.constant 2 : index
    %c0_14 = arith.constant 0 : index
    %c0_15 = arith.constant 0 : index
    %13 = vector.load %arg3[%c2_13, %c0_14, %c0_15] : memref<16x1x32xbf16, #tpu.memory_space<vmem>>, vector<1x1x32xbf16>
    %14 = vector.shape_cast %13 : vector<1x1x32xbf16> to vector<1x32xbf16>
    %cst_16 = arith.constant dense<0.000000e+00> : vector<1x7xf32>
    %15 = tpu.matmul %14, %12, %cst_16 {dimension_numbers = #tpu.dot_dimension_numbers<[1], [0], [0], [1], [0, 0, 1, 1], [], []>} : vector<1x32xbf16>, vector<32x7xbf16>, vector<1x7xf32> -> vector<1x7xf32>
    %16 = arith.addf %10, %15 : vector<1x7xf32>
    %c0_17 = arith.constant 0 : index
    %c0_18 = arith.constant 0 : index
    %c3 = arith.constant 3 : index
    %17 = vector.load %arg2[%c0_17, %c0_18, %c3] : memref<1x32x25xbf16, #tpu.memory_space<vmem>>, vector<1x32x7xbf16>
    %18 = vector.shape_cast %17 : vector<1x32x7xbf16> to vector<32x7xbf16>
    %c3_19 = arith.constant 3 : index
    %c0_20 = arith.constant 0 : index
    %c0_21 = arith.constant 0 : index
    %19 = vector.load %arg3[%c3_19, %c0_20, %c0_21] : memref<16x1x32xbf16, #tpu.memory_space<vmem>>, vector<1x1x32xbf16>
    %20 = vector.shape_cast %19 : vector<1x1x32xbf16> to vector<1x32xbf16>
    %cst_22 = arith.constant dense<0.000000e+00> : vector<1x7xf32>
    %21 = tpu.matmul %20, %18, %cst_22 {dimension_numbers = #tpu.dot_dimension_numbers<[1], [0], [0], [1], [0, 0, 1, 1], [], []>} : vector<1x32xbf16>, vector<32x7xbf16>, vector<1x7xf32> -> vector<1x7xf32>
    %22 = arith.addf %16, %21 : vector<1x7xf32>
    %c0_23 = arith.constant 0 : index
    %c0_24 = arith.constant 0 : index
    %c5 = arith.constant 5 : index
    %23 = vector.load %arg2[%c0_23, %c0_24, %c5] : memref<1x32x25xbf16, #tpu.memory_space<vmem>>, vector<1x32x7xbf16>
    %24 = vector.shape_cast %23 : vector<1x32x7xbf16> to vector<32x7xbf16>
    %c4 = arith.constant 4 : index
    %c0_25 = arith.constant 0 : index
    %c0_26 = arith.constant 0 : index
    %25 = vector.load %arg3[%c4, %c0_25, %c0_26] : memref<16x1x32xbf16, #tpu.memory_space<vmem>>, vector<1x1x32xbf16>
    %26 = vector.shape_cast %25 : vector<1x1x32xbf16> to vector<1x32xbf16>
    %cst_27 = arith.constant dense<0.000000e+00> : vector<1x7xf32>
    %27 = tpu.matmul %26, %24, %cst_27 {dimension_numbers = #tpu.dot_dimension_numbers<[1], [0], [0], [1], [0, 0, 1, 1], [], []>} : vector<1x32xbf16>, vector<32x7xbf16>, vector<1x7xf32> -> vector<1x7xf32>
    %28 = arith.addf %22, %27 : vector<1x7xf32>
    %c0_28 = arith.constant 0 : index
    %c0_29 = arith.constant 0 : index
    %c6 = arith.constant 6 : index
    %29 = vector.load %arg2[%c0_28, %c0_29, %c6] : memref<1x32x25xbf16, #tpu.memory_space<vmem>>, vector<1x32x7xbf16>
    %30 = vector.shape_cast %29 : vector<1x32x7xbf16> to vector<32x7xbf16>
    %c5_30 = arith.constant 5 : index
    %c0_31 = arith.constant 0 : index
    %c0_32 = arith.constant 0 : index
    %31 = vector.load %arg3[%c5_30, %c0_31, %c0_32] : memref<16x1x32xbf16, #tpu.memory_space<vmem>>, vector<1x1x32xbf16>
    %32 = vector.shape_cast %31 : vector<1x1x32xbf16> to vector<1x32xbf16>
    %cst_33 = arith.constant dense<0.000000e+00> : vector<1x7xf32>
    %33 = tpu.matmul %32, %30, %cst_33 {dimension_numbers = #tpu.dot_dimension_numbers<[1], [0], [0], [1], [0, 0, 1, 1], [], []>} : vector<1x32xbf16>, vector<32x7xbf16>, vector<1x7xf32> -> vector<1x7xf32>
    %34 = arith.addf %28, %33 : vector<1x7xf32>
    %c0_34 = arith.constant 0 : index
    %c0_35 = arith.constant 0 : index
    %c7 = arith.constant 7 : index
    %35 = vector.load %arg2[%c0_34, %c0_35, %c7] : memref<1x32x25xbf16, #tpu.memory_space<vmem>>, vector<1x32x7xbf16>
    %36 = vector.shape_cast %35 : vector<1x32x7xbf16> to vector<32x7xbf16>
    %c6_36 = arith.constant 6 : index
    %c0_37 = arith.constant 0 : index
    %c0_38 = arith.constant 0 : index
    %37 = vector.load %arg3[%c6_36, %c0_37, %c0_38] : memref<16x1x32xbf16, #tpu.memory_space<vmem>>, vector<1x1x32xbf16>
    %38 = vector.shape_cast %37 : vector<1x1x32xbf16> to vector<1x32xbf16>
    %cst_39 = arith.constant dense<0.000000e+00> : vector<1x7xf32>
    %39 = tpu.matmul %38, %36, %cst_39 {dimension_numbers = #tpu.dot_dimension_numbers<[1], [0], [0], [1], [0, 0, 1, 1], [], []>} : vector<1x32xbf16>, vector<32x7xbf16>, vector<1x7xf32> -> vector<1x7xf32>
    %40 = arith.addf %34, %39 : vector<1x7xf32>
    %c0_40 = arith.constant 0 : index
    %c0_41 = arith.constant 0 : index
    %c8 = arith.constant 8 : index
    %41 = vector.load %arg2[%c0_40, %c0_41, %c8] : memref<1x32x25xbf16, #tpu.memory_space<vmem>>, vector<1x32x7xbf16>
    %42 = vector.shape_cast %41 : vector<1x32x7xbf16> to vector<32x7xbf16>
    %c7_42 = arith.constant 7 : index
    %c0_43 = arith.constant 0 : index
    %c0_44 = arith.constant 0 : index
    %43 = vector.load %arg3[%c7_42, %c0_43, %c0_44] : memref<16x1x32xbf16, #tpu.memory_space<vmem>>, vector<1x1x32xbf16>
    %44 = vector.shape_cast %43 : vector<1x1x32xbf16> to vector<1x32xbf16>
    %cst_45 = arith.constant dense<0.000000e+00> : vector<1x7xf32>
    %45 = tpu.matmul %44, %42, %cst_45 {dimension_numbers = #tpu.dot_dimension_numbers<[1], [0], [0], [1], [0, 0, 1, 1], [], []>} : vector<1x32xbf16>, vector<32x7xbf16>, vector<1x7xf32> -> vector<1x7xf32>
    %46 = arith.addf %40, %45 : vector<1x7xf32>
    %c0_46 = arith.constant 0 : index
    %c0_47 = arith.constant 0 : index
    %c10 = arith.constant 10 : index
    %47 = vector.load %arg2[%c0_46, %c0_47, %c10] : memref<1x32x25xbf16, #tpu.memory_space<vmem>>, vector<1x32x7xbf16>
    %48 = vector.shape_cast %47 : vector<1x32x7xbf16> to vector<32x7xbf16>
    %c8_48 = arith.constant 8 : index
    %c0_49 = arith.constant 0 : index
    %c0_50 = arith.constant 0 : index
    %49 = vector.load %arg3[%c8_48, %c0_49, %c0_50] : memref<16x1x32xbf16, #tpu.memory_space<vmem>>, vector<1x1x32xbf16>
    %50 = vector.shape_cast %49 : vector<1x1x32xbf16> to vector<1x32xbf16>
    %cst_51 = arith.constant dense<0.000000e+00> : vector<1x7xf32>
    %51 = tpu.matmul %50, %48, %cst_51 {dimension_numbers = #tpu.dot_dimension_numbers<[1], [0], [0], [1], [0, 0, 1, 1], [], []>} : vector<1x32xbf16>, vector<32x7xbf16>, vector<1x7xf32> -> vector<1x7xf32>
    %52 = arith.addf %46, %51 : vector<1x7xf32>
    %c0_52 = arith.constant 0 : index
    %c0_53 = arith.constant 0 : index
    %c11 = arith.constant 11 : index
    %53 = vector.load %arg2[%c0_52, %c0_53, %c11] : memref<1x32x25xbf16, #tpu.memory_space<vmem>>, vector<1x32x7xbf16>
    %54 = vector.shape_cast %53 : vector<1x32x7xbf16> to vector<32x7xbf16>
    %c9 = arith.constant 9 : index
    %c0_54 = arith.constant 0 : index
    %c0_55 = arith.constant 0 : index
    %55 = vector.load %arg3[%c9, %c0_54, %c0_55] : memref<16x1x32xbf16, #tpu.memory_space<vmem>>, vector<1x1x32xbf16>
    %56 = vector.shape_cast %55 : vector<1x1x32xbf16> to vector<1x32xbf16>
    %cst_56 = arith.constant dense<0.000000e+00> : vector<1x7xf32>
    %57 = tpu.matmul %56, %54, %cst_56 {dimension_numbers = #tpu.dot_dimension_numbers<[1], [0], [0], [1], [0, 0, 1, 1], [], []>} : vector<1x32xbf16>, vector<32x7xbf16>, vector<1x7xf32> -> vector<1x7xf32>
    %58 = arith.addf %52, %57 : vector<1x7xf32>
    %c0_57 = arith.constant 0 : index
    %c0_58 = arith.constant 0 : index
    %c12 = arith.constant 12 : index
    %59 = vector.load %arg2[%c0_57, %c0_58, %c12] : memref<1x32x25xbf16, #tpu.memory_space<vmem>>, vector<1x32x7xbf16>
    %60 = vector.shape_cast %59 : vector<1x32x7xbf16> to vector<32x7xbf16>
    %c10_59 = arith.constant 10 : index
    %c0_60 = arith.constant 0 : index
    %c0_61 = arith.constant 0 : index
    %61 = vector.load %arg3[%c10_59, %c0_60, %c0_61] : memref<16x1x32xbf16, #tpu.memory_space<vmem>>, vector<1x1x32xbf16>
    %62 = vector.shape_cast %61 : vector<1x1x32xbf16> to vector<1x32xbf16>
    %cst_62 = arith.constant dense<0.000000e+00> : vector<1x7xf32>
    %63 = tpu.matmul %62, %60, %cst_62 {dimension_numbers = #tpu.dot_dimension_numbers<[1], [0], [0], [1], [0, 0, 1, 1], [], []>} : vector<1x32xbf16>, vector<32x7xbf16>, vector<1x7xf32> -> vector<1x7xf32>
    %64 = arith.addf %58, %63 : vector<1x7xf32>
    %c0_63 = arith.constant 0 : index
    %c0_64 = arith.constant 0 : index
    %c13 = arith.constant 13 : index
    %65 = vector.load %arg2[%c0_63, %c0_64, %c13] : memref<1x32x25xbf16, #tpu.memory_space<vmem>>, vector<1x32x7xbf16>
    %66 = vector.shape_cast %65 : vector<1x32x7xbf16> to vector<32x7xbf16>
    %c11_65 = arith.constant 11 : index
    %c0_66 = arith.constant 0 : index
    %c0_67 = arith.constant 0 : index
    %67 = vector.load %arg3[%c11_65, %c0_66, %c0_67] : memref<16x1x32xbf16, #tpu.memory_space<vmem>>, vector<1x1x32xbf16>
    %68 = vector.shape_cast %67 : vector<1x1x32xbf16> to vector<1x32xbf16>
    %cst_68 = arith.constant dense<0.000000e+00> : vector<1x7xf32>
    %69 = tpu.matmul %68, %66, %cst_68 {dimension_numbers = #tpu.dot_dimension_numbers<[1], [0], [0], [1], [0, 0, 1, 1], [], []>} : vector<1x32xbf16>, vector<32x7xbf16>, vector<1x7xf32> -> vector<1x7xf32>
    %70 = arith.addf %64, %69 : vector<1x7xf32>
    %c0_69 = arith.constant 0 : index
    %c0_70 = arith.constant 0 : index
    %c15 = arith.constant 15 : index
    %71 = vector.load %arg2[%c0_69, %c0_70, %c15] : memref<1x32x25xbf16, #tpu.memory_space<vmem>>, vector<1x32x7xbf16>
    %72 = vector.shape_cast %71 : vector<1x32x7xbf16> to vector<32x7xbf16>
    %c12_71 = arith.constant 12 : index
    %c0_72 = arith.constant 0 : index
    %c0_73 = arith.constant 0 : index
    %73 = vector.load %arg3[%c12_71, %c0_72, %c0_73] : memref<16x1x32xbf16, #tpu.memory_space<vmem>>, vector<1x1x32xbf16>
    %74 = vector.shape_cast %73 : vector<1x1x32xbf16> to vector<1x32xbf16>
    %cst_74 = arith.constant dense<0.000000e+00> : vector<1x7xf32>
    %75 = tpu.matmul %74, %72, %cst_74 {dimension_numbers = #tpu.dot_dimension_numbers<[1], [0], [0], [1], [0, 0, 1, 1], [], []>} : vector<1x32xbf16>, vector<32x7xbf16>, vector<1x7xf32> -> vector<1x7xf32>
    %76 = arith.addf %70, %75 : vector<1x7xf32>
    %c0_75 = arith.constant 0 : index
    %c0_76 = arith.constant 0 : index
    %c16 = arith.constant 16 : index
    %77 = vector.load %arg2[%c0_75, %c0_76, %c16] : memref<1x32x25xbf16, #tpu.memory_space<vmem>>, vector<1x32x7xbf16>
    %78 = vector.shape_cast %77 : vector<1x32x7xbf16> to vector<32x7xbf16>
    %c13_77 = arith.constant 13 : index
    %c0_78 = arith.constant 0 : index
    %c0_79 = arith.constant 0 : index
    %79 = vector.load %arg3[%c13_77, %c0_78, %c0_79] : memref<16x1x32xbf16, #tpu.memory_space<vmem>>, vector<1x1x32xbf16>
    %80 = vector.shape_cast %79 : vector<1x1x32xbf16> to vector<1x32xbf16>
    %cst_80 = arith.constant dense<0.000000e+00> : vector<1x7xf32>
    %81 = tpu.matmul %80, %78, %cst_80 {dimension_numbers = #tpu.dot_dimension_numbers<[1], [0], [0], [1], [0, 0, 1, 1], [], []>} : vector<1x32xbf16>, vector<32x7xbf16>, vector<1x7xf32> -> vector<1x7xf32>
    %82 = arith.addf %76, %81 : vector<1x7xf32>
    %c0_81 = arith.constant 0 : index
    %c0_82 = arith.constant 0 : index
    %c17 = arith.constant 17 : index
    %83 = vector.load %arg2[%c0_81, %c0_82, %c17] : memref<1x32x25xbf16, #tpu.memory_space<vmem>>, vector<1x32x7xbf16>
    %84 = vector.shape_cast %83 : vector<1x32x7xbf16> to vector<32x7xbf16>
    %c14 = arith.constant 14 : index
    %c0_83 = arith.constant 0 : index
    %c0_84 = arith.constant 0 : index
    %85 = vector.load %arg3[%c14, %c0_83, %c0_84] : memref<16x1x32xbf16, #tpu.memory_space<vmem>>, vector<1x1x32xbf16>
    %86 = vector.shape_cast %85 : vector<1x1x32xbf16> to vector<1x32xbf16>
    %cst_85 = arith.constant dense<0.000000e+00> : vector<1x7xf32>
    %87 = tpu.matmul %86, %84, %cst_85 {dimension_numbers = #tpu.dot_dimension_numbers<[1], [0], [0], [1], [0, 0, 1, 1], [], []>} : vector<1x32xbf16>, vector<32x7xbf16>, vector<1x7xf32> -> vector<1x7xf32>
    %88 = arith.addf %82, %87 : vector<1x7xf32>
    %c0_86 = arith.constant 0 : index
    %c0_87 = arith.constant 0 : index
    %c18 = arith.constant 18 : index
    %89 = vector.load %arg2[%c0_86, %c0_87, %c18] : memref<1x32x25xbf16, #tpu.memory_space<vmem>>, vector<1x32x7xbf16>
    %90 = vector.shape_cast %89 : vector<1x32x7xbf16> to vector<32x7xbf16>
    %c15_88 = arith.constant 15 : index
    %c0_89 = arith.constant 0 : index
    %c0_90 = arith.constant 0 : index
    %91 = vector.load %arg3[%c15_88, %c0_89, %c0_90] : memref<16x1x32xbf16, #tpu.memory_space<vmem>>, vector<1x1x32xbf16>
    %92 = vector.shape_cast %91 : vector<1x1x32xbf16> to vector<1x32xbf16>
    %cst_91 = arith.constant dense<0.000000e+00> : vector<1x7xf32>
    %93 = tpu.matmul %92, %90, %cst_91 {dimension_numbers = #tpu.dot_dimension_numbers<[1], [0], [0], [1], [0, 0, 1, 1], [], []>} : vector<1x32xbf16>, vector<32x7xbf16>, vector<1x7xf32> -> vector<1x7xf32>
    %94 = arith.addf %88, %93 : vector<1x7xf32>
    %c0_92 = arith.constant 0 : index
    %c0_93 = arith.constant 0 : index
    %95 = vector.load %arg4[%c0_92, %c0_93] : memref<1x1xf32, #tpu.memory_space<vmem>>, vector<1x1xf32>
    %96 = vector.broadcast %95 : vector<1x1xf32> to vector<1x7xf32>
    %97 = arith.addf %94, %96 : vector<1x7xf32>
    %c0_94 = arith.constant 0 : index
    %c0_95 = arith.constant 0 : index
    %c0_96 = arith.constant 0 : index
    %98 = vector.load %arg5[%c0_94, %c0_95, %c0_96] : memref<1x1x7xf32, #tpu.memory_space<vmem>>, vector<1x1x7xf32>
    %99 = vector.shape_cast %98 : vector<1x1x7xf32> to vector<1x7xf32>
    %100 = vector.shape_cast %97 : vector<1x7xf32> to vector<1x1x7xf32>
    tpu.vector_store %arg5[%c0_94, %c0_95, %c0_96], %100 {strides = array<i32>} : memref<1x1x7xf32, #tpu.memory_space<vmem>>, vector<1x1x7xf32>,
    return
  }
  func.func @transform_0(%arg0: i32, %arg1: i32) -> (i32, i32, i32) {
    %c0_i32 = arith.constant 0 : i32
    %c0_i32_0 = arith.constant 0 : i32
    %c0_i32_1 = arith.constant 0 : i32
    return %arg0, %c0_i32, %c0_i32_0 : i32, i32, i32
  }
  func.func @transform_1(%arg0: i32, %arg1: i32) -> (i32, i32, i32) {
    %c0_i32 = arith.constant 0 : i32
    %c0_i32_0 = arith.constant 0 : i32
    %c0_i32_1 = arith.constant 0 : i32
    return %c0_i32, %arg1, %c0_i32_0 : i32, i32, i32
  }
  func.func @transform_2(%arg0: i32, %arg1: i32) -> (i32, i32) {
    %c0_i32 = arith.constant 0 : i32
    %c0_i32_0 = arith.constant 0 : i32
    return %arg1, %c0_i32 : i32, i32
  }
  func.func @transform_3(%arg0: i32, %arg1: i32) -> (i32, i32, i32) {
    %c0_i32 = arith.constant 0 : i32
    %c0_i32_0 = arith.constant 0 : i32
    return %arg0, %arg1, %c0_i32 : i32, i32, i32
  }
}

</mosaic_0001>

<bundles_post_ra>
// kernel: discriminator_forward.5
= control target key start
LH: loop header
LB: loop body
LE: loop exit
PB: predicated region body
PF: predicated region fallthrough
CT: control target
= control target key end

     0   :  { %s969_s12 = smov 0   ;;  %s971_s13 = smov 0   ;;  %s1061_s0 = inlined_call_operand.vmem [shape: bf16[2,12,289], index: 0, kind: input, shape index: {}]   ;;  %s1062_s1 = inlined_call_operand.vmem [shape: bf16[4,4,12], index: 1, kind: input, shape index: {}]   ;;  %s1063_s2 = inlined_call_operand.vmem [shape: f32[4,1], index: 2, kind: input, shape index: {}]   ;;  %s1064_s3 = inlined_call_operand.vmem [shape: bf16[2,4,271], index: 3, kind: output, shape index: {}]  }
   0x1   :  { %s973_s14 = smov 0  }
   0x2 LB: > { %s25_s15 = sadd.s32 1, %s936_s13  ;;  %p823_p0 = scmp.ge.s32.totalorder %s940_s14, 1  ;;  %s940_s14 = sphi %s973_s14, %s13_s14   ;;  %s936_s13 = sphi %s971_s13, %s1066_s13   ;;  %s932_s12 = sphi %s969_s12, %s1065_s12  }
   0x3   : > { %p27_p1 = scmp.ge.s32.totalorder %s25_s15, 2  ;;  %p169_p2 = scmp.lt.s32.totalorder %s940_s14, 3 }
   0x5   : > { %s1068_s15 = smov (%p27_p1, %s25_s15), 0  ;;  %p170_p3 = pnand %p823_p0, %p169_p2 }
   0x6   : > { %p205_p4 = scmp.lt.s32.totalorder (!%p170_p3), %s932_s12, 1  ;;  %v942_v0 = vmov (!%p170_p3), 0.0   ;;  %vm943_vm0 = vmmov (!%p170_p3), 0   ;;  %v944_v1 = vmov (!%p170_p3), 0   ;;  %s945_s20 = smov (!%p170_p3), 127   ;;  %vm261_vm1 = vcmask (!%p170_p3), 1045504  }
   0x7   : > { %173 = sbr.rel (%p170_p3) target bundleno = 396 (0x18c), region = 32  ;;  %855 = vmatprep.subr.bf16.mxu1 (!%p170_p3), %v942_v0  ;;  %857 = vmatprep.mubr.msk.bf16.mxu1 (!%p170_p3), %vm943_vm0, %v942_v0  ;;  %s946_s21 = smov (!%p170_p3), 111   ;;  %v659_v5 = vld [vmem:[%s1063_s2] sm:$0xf] (!%p170_p3)  ;;  %vm257_vm2 = vcmask (!%p170_p3), 97280   ;;  %vm254_vm3 = vcmask (!%p170_p3), 1039360  }
   0x8   : > { %303 = vmatprep.mubr.bf16.mxu0 (!%p170_p3), %v944_v1  ;;  %912 = vset.pattern.permute.xlu1 (!%p170_p3), %v944_v1  ;;  %s947_s22 = smov (!%p170_p3), 110   ;;  %v826_v9 = vld [vmem:[%s1062_s1 + $0x2] sm:$0x3] (!%p170_p3)  ;;  %vm453_vm4 = vcmask (!%p170_p3), 908288   ;;  %v232_v19 = vld [vmem:[%s1062_s1] sm:$0x3] (!%p170_p3) }
   0x9   : > { %913 = vset.pattern.permute.xlu0 (!%p170_p3), %v944_v1  ;;  %vm560_vm5 = vcmask (!%p170_p3), 900096   ;;  %v836_v27 = vld [vmem:[%s1062_s1 + $0x4] sm:$0x3] (!%p170_p3)  ;;  %v840_v32 = vld [vmem:[%s1062_s1 + $0x6] sm:$0x3] (!%p170_p3)  ;;  %vm697_vm6 = vcmask (!%p170_p3), 1041408  }
   0xa   : > { %vm698_vm7 = vcmask (!%p170_p3), 1043458   ;;  %vm700_vm9 = vcmask (!%p170_p3), 119812  }
   0xb   : > { %vm699_vm8 = vmor (!%p170_p3), %vm698_vm7, %vm697_vm6 }
   0xc   : > { %vm701_vm10 = vmor (!%p170_p3), %vm700_vm9, %vm699_vm8 }
   0xe   : > { %s1070_s12 = smov (!%p205_p4, %s932_s12), 1 }
   0xf   : > { %s879_s16 = smul.u32 24, %s1070_s12 }
  0x10   : > { %s880_s6 = smul.u32 6, %s1070_s12 }
  0x11   : > { %s209_s19 = scalar_lea.vmem %s1061_s0, %s879_s16 }
  0x12   : > { %v914_v2 = vld [vmem:[%s209_s19 + $0x8] ss:$12 sps:$4 sm:$0x3f]   ;;  %v915_v3 = vld [vmem:[%s209_s19] ss:$12 sps:$4 sm:$0x3f]   ;;  %s226_s9 = scalar_lea.vmem %s1064_s3, %s880_s6 }
  0x13   : > { %252 = vrot.lane.b32.xlu1 %v914_v2, %s945_s20  ;;  %248 = vrot.lane.b32.xlu0 %v915_v3, %s945_s20  ;;  %v917_v4 = vld [vmem:[%s209_s19 + $0x4] ss:$12 sps:$4 sm:$0x3f]   ;;  %v362_v10 = vsel %vm261_vm1, %v914_v2, 0  ;;  %v356_v17 = vsel %vm261_vm1, %v915_v3, 0 }
  0x17   : > { %447 = vrot.lane.b32.xlu1 %v915_v3, %s946_s21  ;;  %250 = vrot.lane.b32.xlu0 %v917_v4, %s945_s20 }
  0x1b   : > { %451 = vrot.lane.b32.xlu1 %v914_v2, %s946_s21  ;;  %449 = vrot.lane.b32.xlu0 %v917_v4, %s946_s21 }
  0x1f   : > { %556 = vrot.lane.b32.xlu1 %v917_v4, %s947_s22  ;;  %554 = vrot.lane.b32.xlu0 %v915_v3, %s947_s22 }
  0x23   : > { %558 = vrot.lane.b32.xlu0 %v914_v2, %s947_s22  ;;  %662 = vperm.xlu1 %912, %v659_v5  }
  0x85   : > { %v253_v6 = vpop.permute.xlu1 %252  ;;  %v249_v7 = vpop.permute.xlu0 %248 }
  0x86   : > { %v269_v8 = vsel %vm261_vm1, %v253_v6, 0 }
  0x87   : > { %856 = vmatpush3.bf16.msra.mxu1 %v269_v8  ;;  %v684_v8 = vlaneseq }
  0x88   : > { %861 = vmatprep.subr.bf16.mxu1 %v942_v0 }
  0x89   : > { %v448_v11 = vpop.permute.xlu1 %447  ;;  %v251_v12 = vpop.permute.xlu0 %250 }
  0x8a   : > { %858 = vmatmul.mubr.msk.bf16.vlgmr.msra.gmra.mrb[0].mxu1 %vm257_vm2, %v826_v9  ;;  %v256_v13 = vsel %vm254_vm3, %v251_v12, %v253_v6  ;;  %v255_v14 = vsel %vm254_vm3, %v249_v7, %v251_v12  ;;  %v948_v6 = vmov 1983009808  }
  0x8b   : > { %862 = vmatpush3.bf16.msra.mxu1 %v362_v10  ;;  %863 = vmatprep.mubr.msk.bf16.mxu1 %vm943_vm0, %v942_v0  ;;  %v263_v15 = vsel %vm261_vm1, %v255_v14, 0  ;;  %v682_v7 = vunpack.c.l.s4 %v948_v6 }
  0x8c   : > { %830 = vmatprep.subr.msk.bf16.mxu0 %vm261_vm1, %v256_v13  ;;  %867 = vmatprep.subr.bf16.mxu1 %v942_v0 }
  0x8d   : > { %272 = vmatpush1.bf16.msra.mxu0 %v263_v15  ;;  %v452_v16 = vpop.permute.xlu1 %451  ;;  %v450_v18 = vpop.permute.xlu0 %449 }
  0x8e   : > { %833 = vmatprep.subr.msk.bf16.mxu0 %vm261_vm1, %v917_v4  ;;  %v455_v20 = vsel %vm453_vm4, %v450_v18, %v452_v16  ;;  %v466_v21 = vsel %vm261_vm1, %v452_v16, 0  ;;  %v454_v23 = vsel %vm453_vm4, %v448_v11, %v450_v18  ;;  %v685_v18 = vshrl.u32 %v684_v8, 7 }
  0x8f   : > { %v460_v25 = vsel %vm261_vm1, %v454_v23, 0 }
  0x90   : > { %831 = vmatmul.mubr.msk.bf16.vlgmr.msra.gmra.mrb[0].mxu0 %vm257_vm2, %v826_v9 }
  0x91   : > { %365 = vmatpush1.bf16.msra.mxu0 %v356_v17  ;;  %396 = vmatprep.mubr.bf16.mxu0 %v944_v1  ;;  %v555_v22 = vpop.permute.xlu0 %554  ;;  %v557_v24 = vpop.permute.xlu1 %556  ;;  %v683_v17 = vunpack.c.0.s8 %v682_v7 }
  0x92   : > { %864 = vmatmul.mubr.msk.bf16.vlgmr.msra.gmra.mrb[4].mxu1 %vm257_vm2, %v232_v19  ;;  %837 = vmatprep.subr.msk.bf16.mxu0 %vm261_vm1, %v455_v20  ;;  %v561_v30 = vsel %vm560_vm5, %v555_v22, %v557_v24 }
  0x93   : > { %868 = vmatpush3.bf16.msra.mxu1 %v466_v21  ;;  %869 = vmatprep.mubr.msk.bf16.mxu1 %vm943_vm0, %v942_v0  ;;  %v567_v31 = vsel %vm261_vm1, %v561_v30, 0 }
  0x94   : > { %873 = vmatprep.subr.bf16.mxu1 %v942_v0 }
  0x95   : > { %v559_v26 = vpop.permute.xlu0 %558 }
  0x96   : > { %v562_v28 = vsel %vm560_vm5, %v557_v24, %v559_v26  ;;  %v573_v29 = vsel %vm261_vm1, %v559_v26, 0  ;;  %v686_v24 = vsub.s32 %v683_v17, %v685_v18 }
  0x98   : > { %834 = vmatmul.mubr.msk.bf16.vlgmr.msra.gmra.mrb[4].mxu0 %vm257_vm2, %v232_v19 }
  0x99   : > { %469 = vmatpush1.bf16.msra.mxu0 %v460_v25  ;;  %500 = vmatprep.mubr.bf16.mxu0 %v944_v1 }
  0x9a   : > { %870 = vmatmul.mubr.msk.bf16.vlgmr.msra.gmra.mrb[8].mxu1 %vm257_vm2, %v836_v27  ;;  %841 = vmatprep.subr.msk.bf16.mxu0 %vm261_vm1, %v562_v28 }
  0x9b   : > { %874 = vmatpush3.bf16.msra.mxu1 %v573_v29  ;;  %875 = vmatprep.mubr.msk.bf16.mxu1 %vm943_vm0, %v942_v0 }
  0xa0   : > { %838 = vmatmul.mubr.msk.bf16.vlgmr.msra.gmra.mrb[8].mxu0 %vm257_vm2, %v836_v27 }
  0xa1   : > { %576 = vmatpush1.bf16.msra.mxu0 %v567_v31  ;;  %607 = vmatprep.mubr.bf16.mxu0 %v944_v1 }
  0xa2   : > { %876 = vmatmul.mubr.msk.bf16.vlgmr.msra.gmra.mrb[12].mxu1 %vm257_vm2, %v840_v32  ;;  %v663_v60 = vpop.permute.xlu1 %662 }
  0xa8   : > { %842 = vmatmul.mubr.msk.bf16.vlgmr.msra.gmra.mrb[12].mxu0 %vm257_vm2, %v840_v32 }
 0x15d   : > { %v346_v33 = vpop.f32.mrb[0].mxu1 }
 0x15e   : > { %v859_v34 = vpop.f32.mrb[1].mxu1 }
 0x15f   : > { %v349_v35 = vpop.f32.mrb[2].mxu1 }
 0x160   : > { %v860_v36 = vpop.f32.mrb[3].mxu1 }
 0x163   : > { %v305_v37 = vpop.f32.mrb[0].mxu0 }
 0x164   : > { %v307_v38 = vpop.f32.mrb[1].mxu0 }
 0x165   : > { %v309_v39 = vpop.f32.mrb[2].mxu0  ;;  %v439_v40 = vpop.f32.mrb[4].mxu1 }
 0x166   : > { %v310_v41 = vpop.f32.mrb[3].mxu0  ;;  %v440_v42 = vadd.f32 %v439_v40, %v346_v33  ;;  %v865_v43 = vpop.f32.mrb[5].mxu1 }
 0x167   : > { %v442_v44 = vpop.f32.mrb[6].mxu1 }
 0x168   : > { %v866_v45 = vpop.f32.mrb[7].mxu1 }
 0x16b   : > { %v398_v46 = vpop.f32.mrb[4].mxu0 }
 0x16c   : > { %v399_v47 = vadd.f32 %v398_v46, %v305_v37  ;;  %v400_v48 = vpop.f32.mrb[5].mxu0 }
 0x16d   : > { %v401_v49 = vadd.f32 %v400_v48, %v307_v38  ;;  %v402_v50 = vpop.f32.mrb[6].mxu0  ;;  %v543_v51 = vpop.f32.mrb[8].mxu1 }
 0x16e   : > { %v403_v52 = vpop.f32.mrb[7].mxu0  ;;  %v551_v53 = vadd.f32 %v543_v51, %v440_v42  ;;  %v871_v54 = vpop.f32.mrb[9].mxu1 }
 0x16f   : > { %v546_v55 = vpop.f32.mrb[10].mxu1 }
 0x170   : > { %v872_v56 = vpop.f32.mrb[11].mxu1 }
 0x173   : > { %v502_v57 = vpop.f32.mrb[8].mxu0 }
 0x174   : > { %v549_v58 = vadd.f32 %v502_v57, %v399_v47  ;;  %v504_v59 = vpop.f32.mrb[9].mxu0 }
 0x175   : > { %v550_v61 = vadd.f32 %v504_v59, %v401_v49  ;;  %v506_v62 = vpop.f32.mrb[10].mxu0  ;;  %v650_v63 = vpop.f32.mrb[12].mxu1 }
 0x176   : > { %v507_v0 = vpop.f32.mrb[11].mxu0  ;;  %v658_v1 = vadd.f32 %v650_v63, %v551_v53  ;;  %v877_v2 = vpop.f32.mrb[13].mxu1 }
 0x177   : > { %v653_v3 = vpop.f32.mrb[14].mxu1 }
 0x178   : > { %v667_v4 = vadd.f32 %v663_v60, %v658_v1  ;;  %v878_v5 = vpop.f32.mrb[15].mxu1 }
 0x17a   : > { %v670_v9 = vmul.f32 0.2, %v667_v4 }
 0x17b   : > { %v609_v10 = vpop.f32.mrb[12].mxu0 }
 0x17c   : > { %v656_v11 = vadd.f32 %v609_v10, %v549_v58  ;;  %v611_v12 = vpop.f32.mrb[13].mxu0  ;;  %v673_v19 = vmax.f32 %v667_v4, %v670_v9 }
 0x17d   : > { %v657_v13 = vadd.f32 %v611_v12, %v550_v61  ;;  %v613_v14 = vpop.f32.mrb[14].mxu0 }
 0x17e   : > { %v665_v15 = vadd.f32 %v663_v60, %v656_v11  ;;  %v614_v16 = vpop.f32.mrb[15].mxu0  ;;  %v676_v25 = vpack.c.bf16 %v673_v19, %v673_v19 }
 0x17f   : > { %v666_v20 = vadd.f32 %v663_v60, %v657_v13 }
 0x180   : > { %v668_v21 = vmul.f32 0.2, %v665_v15  ;;  %v694_v28 = vrot.slane %v676_v25, %v686_v24 }
 0x181   : > { %v669_v22 = vmul.f32 0.2, %v666_v20 }
 0x182   : > { %v671_v23 = vmax.f32 %v665_v15, %v668_v21 }
 0x183   : > { %v672_v26 = vmax.f32 %v666_v20, %v669_v22 }
 0x185   : > { %v844_v27 = vpack.c.bf16 %v672_v26, %v671_v23 }
 0x187   : > { %v687_v29 = vrot.slane %v844_v27, %v686_v24 }
 0x189   : > { %v695_v30 = vcombine.low %v687_v29, %v694_v28 }
 0x18b   : > { %702 = vst.msk [vmem:[%s226_s9] sm:$0x3f] %vm701_vm10, %v695_v30 }
 0x18c PF: > { %s13_s14 = sadd.s32 1, %s940_s14   ;;  %s1065_s12 = smov %s936_s13 }
 0x18d   : > { %p10_p5 = scmp.ge.s32.totalorder %s13_s14, 4   ;;  %s1066_s13 = smov %s1068_s15 }
 0x18f   :  { %12 = sbr.rel (!%p10_p5) target bundleno = 2 (0x2), region = 71 }

// kernel: discriminator_forward.6
= control target key start
LH: loop header
LB: loop body
LE: loop exit
PB: predicated region body
PF: predicated region fallthrough
CT: control target
= control target key end

     0   :  { %s664_s12 = smov 0   ;;  %s666_s13 = smov 0   ;;  %s724_s0 = inlined_call_operand.vmem [shape: bf16[2,16,81], index: 0, kind: input, shape index: {}]   ;;  %s725_s1 = inlined_call_operand.vmem [shape: bf16[4,8,16], index: 1, kind: input, shape index: {}]   ;;  %s726_s2 = inlined_call_operand.vmem [shape: f32[1,71], index: 2, kind: input, shape index: {}]   ;;  %s727_s3 = inlined_call_operand.vmem [shape: bf16[2,8,71], index: 3, kind: output, shape index: {}]  }
   0x1   :  { %s668_s14 = smov 0  }
   0x2 LB: > { %s25_s15 = sadd.s32 1, %s633_s13  ;;  %p526_p0 = scmp.ge.s32.totalorder %s637_s14, 1  ;;  %s637_s14 = sphi %s668_s14, %s13_s14   ;;  %s633_s13 = sphi %s666_s13, %s729_s13   ;;  %s629_s12 = sphi %s664_s12, %s728_s12  }
   0x3   : > { %p27_p1 = scmp.ge.s32.totalorder %s25_s15, 2  ;;  %p160_p2 = scmp.lt.s32.totalorder %s637_s14, 3 }
   0x5   : > { %s731_s15 = smov (%p27_p1, %s25_s15), 0  ;;  %p161_p3 = pnand %p526_p0, %p160_p2 }
   0x6   : > { %p190_p4 = scmp.lt.s32.totalorder (!%p161_p3), %s629_s12, 1  ;;  %v639_v0 = vmov (!%p161_p3), 0.0   ;;  %vm640_vm0 = vmmov (!%p161_p3), 0   ;;  %s641_s20 = smov (!%p161_p3), 127   ;;  %v530_v3 = vld [vmem:[%s725_s1 + $0x4] sm:$0xf] (!%p161_p3) }
   0x7   : > { %164 = sbr.rel (%p161_p3) target bundleno = 686 (0x2ae), region = 32  ;;  %550 = vmatprep.subr.bf16.mxu1 (!%p161_p3), %v639_v0  ;;  %552 = vmatprep.mubr.msk.bf16.mxu1 (!%p161_p3), %vm640_vm0, %v639_v0  ;;  %s642_s21 = smov (!%p161_p3), 118   ;;  %vm220_vm1 = vcmask (!%p161_p3), 130048   ;;  %v534_v5 = vld [vmem:[%s725_s1 + $0x8] sm:$0xf] (!%p161_p3)  ;;  %vm414_vm2 = vcmask (!%p161_p3), 580608  }
   0x8   : > { %562 = vmatprep.subr.bf16.mxu0 (!%p161_p3), %v639_v0  ;;  %564 = vmatprep.mubr.msk.bf16.mxu0 (!%p161_p3), %vm640_vm0, %v639_v0  ;;  %s643_s22 = smov (!%p161_p3), 119   ;;  %v209_v7 = vld [vmem:[%s725_s1] sm:$0xf] (!%p161_p3)  ;;  %v536_v8 = vld [vmem:[%s725_s1 + $0xc] sm:$0xf] (!%p161_p3)  ;;  %vm432_vm3 = vcmask (!%p161_p3), 576512  }
   0x9   : > { %v538_v14 = vld [vmem:[%s726_s2] ss:$0 sm:$0xff] (!%p161_p3) }
   0xe   : > { %s733_s12 = smov (!%p190_p4, %s629_s12), 1 }
   0xf   : > { %s541_s16 = sshll.u32 %s733_s12, 3  ;;  %s529_s6 = sshll.u32 %s733_s12, 2 }
  0x10   : > { %s194_s19 = scalar_lea.vmem %s724_s0, %s541_s16  ;;  %s205_s9 = scalar_lea.vmem %s727_s3, %s529_s6 }
  0x11   : > { %v612_v1 = vld [vmem:[%s194_s19] sm:$0xff]  }
  0x12   : > { %217 = vrot.lane.b32.xlu0 %v612_v1, %s641_s20  ;;  %359 = vrot.lane.b32.xlu1 %v612_v1, %s642_s21 }
  0x16   : > { %310 = vrot.lane.b32.xlu0 %v612_v1, %s643_s22 }
  0x84   : > { %v218_v2 = vpop.permute.xlu0 %217  ;;  %v360_v6 = vpop.permute.xlu1 %359 }
  0x85   : > { %551 = vmatpush3.bf16.msra.mxu1 %v218_v2 }
  0x86   : > { %556 = vmatprep.subr.bf16.mxu1 %v639_v0 }
  0x88   : > { %553 = vmatmul.mubr.msk.bf16.vlgmr.msra.gmra.mrb[0].mxu1 %vm220_vm1, %v530_v3  ;;  %v311_v4 = vpop.permute.xlu0 %310 }
  0x89   : > { %563 = vmatpush3.bf16.msra.mxu0 %v311_v4  ;;  %557 = vmatpush3.bf16.msra.mxu1 %v612_v1 }
  0x8a   : > { %568 = vmatprep.subr.bf16.mxu0 %v639_v0  ;;  %558 = vmatprep.mubr.msk.bf16.mxu1 %vm640_vm0, %v639_v0 }
  0x8c   : > { %565 = vmatmul.mubr.msk.bf16.vlgmr.msra.gmra.mrb[0].mxu0 %vm220_vm1, %v534_v5 }
  0x8d   : > { %569 = vmatpush3.bf16.msra.mxu0 %v360_v6  ;;  %570 = vmatprep.mubr.msk.bf16.mxu0 %vm640_vm0, %v639_v0 }
  0x94   : > { %559 = vmatmul.mubr.msk.bf16.vlgmr.msra.gmra.mrb[0].mxu1 %vm220_vm1, %v209_v7 }
  0x98   : > { %571 = vmatmul.mubr.msk.bf16.vlgmr.msra.gmra.mrb[0].mxu0 %vm220_vm1, %v536_v8 }
 0x167   : > { %v302_v9 = vpop.f32.mrb[0].mxu1 }
 0x168   : > { %v560_v10 = vpop.f32.mrb[1].mxu1 }
 0x169   : > { %v305_v11 = vpop.f32.mrb[2].mxu1 }
 0x16a   : > { %v561_v12 = vpop.f32.mrb[3].mxu1 }
 0x16b   : > { %v399_v13 = vpop.f32.mrb[0].mxu0 }
 0x16c   : > { %v574_v15 = vadd.f32 %v399_v13, %v302_v9  ;;  %v572_v16 = vpop.f32.mrb[1].mxu0 }
 0x16d   : > { %v402_v17 = vpop.f32.mrb[2].mxu0 }
 0x16e   : > { %v573_v18 = vpop.f32.mrb[3].mxu0  ;;  %v413_v19 = vmul.f32 %v574_v15, %v538_v14 }
 0x170   : > { %v415_v20 = vsel %vm414_vm2, %v413_v19, 0.0 }
 0x171   : > { %416 = vadd.xlane.f32.xlu1 %v415_v20 }
 0x1fe   : > { %v417_v21 = vpop.xlane.xlu1 %416 }
 0x1ff   : > { %v418_v22 = vmul.f32 0.015625, %v417_v21 }
 0x201   : > { %v419_v23 = vsub.f32 %v574_v15, %v418_v22 }
 0x203   : > { %v420_v24 = vmul.f32 %v538_v14, %v419_v23 }
 0x205   : > { %v421_v25 = vmul.f32 %v420_v24, %v420_v24 }
 0x207   : > { %v422_v26 = vsel %vm414_vm2, %v421_v25, 0.0 }
 0x208   : > { %423 = vadd.xlane.f32.xlu0 %v422_v26 }
 0x295   : > { %v424_v27 = vpop.xlane.xlu0 %423 }
 0x296   : > { %v425_v28 = vmul.f32 0.015625, %v424_v27 }
 0x298   : > { %v426_v29 = vadd.f32 1e-05, %v425_v28 }
 0x29a   : > { %613 = vrsqrt.f32 %v426_v29 }
 0x2a4   : > { %v614_v30 = vpop.eup %613 }
 0x2a5   : > { %v428_v31 = vmul.f32 %v614_v30, %v419_v23 }
 0x2a7   : > { %v429_v32 = vmul.f32 0.2, %v428_v31 }
 0x2a9   : > { %v430_v33 = vmax.f32 %v428_v31, %v429_v32 }
 0x2ab   : > { %v431_v34 = vpack.c.bf16 %v430_v33, %v430_v33 }
 0x2ad   : > { %433 = vst.msk [vmem:[%s205_s9] sm:$0xf] %vm432_vm3, %v431_v34 }
 0x2ae PF: > { %s13_s14 = sadd.s32 1, %s637_s14   ;;  %s728_s12 = smov %s633_s13 }
 0x2af   : > { %p10_p5 = scmp.ge.s32.totalorder %s13_s14, 4   ;;  %s729_s13 = smov %s731_s15 }
 0x2b1   :  { %12 = sbr.rel (!%p10_p5) target bundleno = 2 (0x2), region = 68 }

// kernel: discriminator_forward.7
= control target key start
LH: loop header
LB: loop body
LE: loop exit
PB: predicated region body
PF: predicated region fallthrough
CT: control target
= control target key end

     0   :  { %s789_s12 = smov 0   ;;  %s791_s13 = smov 0   ;;  %s853_s0 = inlined_call_operand.vmem [shape: bf16[2,32,25], index: 0, kind: input, shape index: {}]   ;;  %s854_s1 = inlined_call_operand.vmem [shape: bf16[4,16,32], index: 1, kind: input, shape index: {}]   ;;  %s855_s2 = inlined_call_operand.vmem [shape: f32[1,19], index: 2, kind: input, shape index: {}]   ;;  %s856_s3 = inlined_call_operand.vmem [shape: bf16[2,16,19], index: 3, kind: output, shape index: {}]  }
   0x1   :  { %s793_s14 = smov 0  }
   0x2 LB: > { %s25_s15 = sadd.s32 1, %s758_s13  ;;  %p617_p0 = scmp.ge.s32.totalorder %s762_s14, 1  ;;  %s762_s14 = sphi %s793_s14, %s13_s14   ;;  %s758_s13 = sphi %s791_s13, %s858_s13   ;;  %s754_s12 = sphi %s789_s12, %s857_s12  }
   0x3   : > { %p27_p1 = scmp.ge.s32.totalorder %s25_s15, 2  ;;  %p162_p2 = scmp.lt.s32.totalorder %s762_s14, 3 }
   0x5   : > { %s860_s15 = smov (%p27_p1, %s25_s15), 0  ;;  %p163_p3 = pnand %p617_p0, %p162_p2 }
   0x6   : > { %p195_p4 = scmp.lt.s32.totalorder (!%p163_p3), %s754_s12, 1  ;;  %v764_v0 = vmov (!%p163_p3), 0.0   ;;  %vm765_vm0 = vmmov (!%p163_p3), 0   ;;  %s766_s20 = smov (!%p163_p3), 127   ;;  %v732_v6 = vld [vmem:[%s854_s1 + $0x8] sm:$0xff] (!%p163_p3)   ;;  %vm247_vm1 = vcmask (!%p163_p3), 261120  }
   0x7   : > { %166 = sbr.rel (%p163_p3) target bundleno = 694 (0x2b6), region = 32  ;;  %659 = vmatprep.subr.bf16.mxu1 (!%p163_p3), %v764_v0  ;;  %675 = vmatprep.subr.bf16.mxu0 (!%p163_p3), %v764_v0  ;;  %s767_s21 = smov (!%p163_p3), 123   ;;  %v733_v8 = vld [vmem:[%s854_s1 + $0x10] sm:$0xff] (!%p163_p3)   ;;  %v734_v11 = vld [vmem:[%s854_s1] sm:$0xff] (!%p163_p3)   ;;  %v735_v12 = vld [vmem:[%s854_s1 + $0x18] sm:$0xff] (!%p163_p3)   ;;  %vm472_vm2 = vcmask (!%p163_p3), 154624  }
   0x8   : > { %663 = vmatprep.mubr.msk.bf16.mxu1 (!%p163_p3), %vm765_vm0, %v764_v0  ;;  %679 = vmatprep.mubr.msk.bf16.mxu0 (!%p163_p3), %vm765_vm0, %v764_v0  ;;  %s768_s22 = smov (!%p163_p3), 122   ;;  %v638_v18 = vld [vmem:[%s855_s2] ss:$0 sm:$0xff] (!%p163_p3)  ;;  %vm513_vm3 = vcmask (!%p163_p3), 150528  }
   0xe   : > { %s862_s12 = smov (!%p195_p4, %s754_s12), 1 }
   0xf   : > { %s643_s16 = sshll.u32 %s862_s12, 4  ;;  %s644_s6 = sshll.u32 %s862_s12, 3 }
  0x10   : > { %s199_s19 = scalar_lea.vmem %s853_s0, %s643_s16  ;;  %s214_s9 = scalar_lea.vmem %s856_s3, %s644_s6 }
  0x11   : > { %v730_v1 = vld [vmem:[%s199_s19] sm:$0xff]   ;;  %v731_v2 = vld [vmem:[%s199_s19 + $0x8] sm:$0xff]  }
  0x12   : > { %241 = vrot.lane.b32.xlu0 %v730_v1, %s766_s20  ;;  %243 = vrot.lane.b32.xlu1 %v731_v2, %s766_s20 }
  0x16   : > { %351 = vrot.lane.b32.xlu0 %v730_v1, %s767_s21  ;;  %353 = vrot.lane.b32.xlu1 %v731_v2, %s767_s21 }
  0x1a   : > { %411 = vrot.lane.b32.xlu0 %v730_v1, %s768_s22  ;;  %413 = vrot.lane.b32.xlu1 %v731_v2, %s768_s22 }
  0x84   : > { %v242_v3 = vpop.permute.xlu0 %241  ;;  %v244_v4 = vpop.permute.xlu1 %243 }
  0x85   : > { %660 = vmatpush3.bf16.msra.mxu1 %v242_v3 }
  0x86   : > { %661 = vmatprep.subr.bf16.mxu1 %v764_v0 }
  0x88   : > { %v352_v5 = vpop.permute.xlu0 %351  ;;  %v354_v7 = vpop.permute.xlu1 %353 }
  0x89   : > { %662 = vmatpush3.bf16.msra.mxu1 %v244_v4  ;;  %676 = vmatpush3.bf16.msra.mxu0 %v352_v5 }
  0x8a   : > { %677 = vmatprep.subr.bf16.mxu0 %v764_v0  ;;  %667 = vmatprep.subr.bf16.mxu1 %v764_v0 }
  0x8c   : > { %664 = vmatmul.mubr.msk.bf16.vlgmr.msra.gmra.mrb[0].mxu1 %vm247_vm1, %v732_v6  ;;  %v412_v9 = vpop.permute.xlu0 %411  ;;  %v414_v10 = vpop.permute.xlu1 %413 }
  0x8d   : > { %678 = vmatpush3.bf16.msra.mxu0 %v354_v7  ;;  %668 = vmatpush3.bf16.msra.mxu1 %v730_v1 }
  0x8e   : > { %683 = vmatprep.subr.bf16.mxu0 %v764_v0  ;;  %669 = vmatprep.subr.bf16.mxu1 %v764_v0 }
  0x8f   : > { %671 = vmatprep.mubr.msk.bf16.mxu1 %vm765_vm0, %v764_v0 }
  0x90   : > { %680 = vmatmul.mubr.msk.bf16.vlgmr.msra.gmra.mrb[0].mxu0 %vm247_vm1, %v733_v8 }
  0x91   : > { %684 = vmatpush3.bf16.msra.mxu0 %v412_v9  ;;  %670 = vmatpush3.bf16.msra.mxu1 %v731_v2 }
  0x92   : > { %685 = vmatprep.subr.bf16.mxu0 %v764_v0  ;;  %687 = vmatprep.mubr.msk.bf16.mxu0 %vm765_vm0, %v764_v0 }
  0x95   : > { %686 = vmatpush3.bf16.msra.mxu0 %v414_v10 }
  0x98   : > { %672 = vmatmul.mubr.msk.bf16.vlgmr.msra.gmra.mrb[0].mxu1 %vm247_vm1, %v734_v11 }
  0x9c   : > { %688 = vmatmul.mubr.msk.bf16.vlgmr.msra.gmra.mrb[0].mxu0 %vm247_vm1, %v735_v12 }
 0x16b   : > { %v336_v13 = vpop.f32.mrb[0].mxu1 }
 0x16c   : > { %v673_v14 = vpop.f32.mrb[1].mxu1 }
 0x16d   : > { %v339_v15 = vpop.f32.mrb[2].mxu1 }
 0x16e   : > { %v674_v16 = vpop.f32.mrb[3].mxu1 }
 0x16f   : > { %v454_v17 = vpop.f32.mrb[0].mxu0 }
 0x170   : > { %v691_v19 = vadd.f32 %v454_v17, %v336_v13  ;;  %v689_v20 = vpop.f32.mrb[1].mxu0 }
 0x171   : > { %v457_v21 = vpop.f32.mrb[2].mxu0 }
 0x172   : > { %v692_v22 = vadd.f32 %v457_v21, %v339_v15  ;;  %v690_v23 = vpop.f32.mrb[3].mxu0  ;;  %v470_v24 = vmul.f32 %v691_v19, %v638_v18 }
 0x174   : > { %v473_v25 = vsel %vm472_vm2, %v470_v24, 0.0  ;;  %v471_v26 = vmul.f32 %v692_v22, %v638_v18 }
 0x175   : > { %474 = vadd.xlane.f32.xlu0 %v473_v25 }
 0x176   : > { %v476_v27 = vsel %vm472_vm2, %v471_v26, 0.0 }
 0x177   : > { %477 = vadd.xlane.f32.xlu1 %v476_v27 }
 0x202   : > { %v475_v28 = vpop.xlane.xlu0 %474 }
 0x203   : > { %v479_v29 = vmul.f32 0.0625, %v475_v28 }
 0x204   : > { %v478_v30 = vpop.xlane.xlu1 %477 }
 0x205   : > { %v481_v31 = vsub.f32 %v691_v19, %v479_v29  ;;  %v480_v32 = vmul.f32 0.0625, %v478_v30 }
 0x207   : > { %v482_v33 = vsub.f32 %v692_v22, %v480_v32  ;;  %v483_v34 = vmul.f32 %v638_v18, %v481_v31 }
 0x209   : > { %v485_v35 = vmul.f32 %v483_v34, %v483_v34  ;;  %v484_v36 = vmul.f32 %v638_v18, %v482_v33 }
 0x20b   : > { %v487_v37 = vsel %vm472_vm2, %v485_v35, 0.0  ;;  %v486_v38 = vmul.f32 %v484_v36, %v484_v36 }
 0x20c   : > { %488 = vadd.xlane.f32.xlu0 %v487_v37 }
 0x20d   : > { %v490_v39 = vsel %vm472_vm2, %v486_v38, 0.0 }
 0x210   : > { %491 = vadd.xlane.f32.xlu0 %v490_v39 }
 0x299   : > { %v489_v40 = vpop.xlane.xlu0 %488 }
 0x29a   : > { %v493_v41 = vmul.f32 0.0625, %v489_v40 }
 0x29c   : > { %v495_v42 = vadd.f32 1e-05, %v493_v41 }
 0x29d   : > { %v492_v43 = vpop.xlane.xlu0 %491 }
 0x29e   : > { %736 = vrsqrt.f32 %v495_v42  ;;  %v494_v44 = vmul.f32 0.0625, %v492_v43 }
 0x2a0   : > { %v496_v45 = vadd.f32 1e-05, %v494_v44 }
 0x2a2   : > { %738 = vrsqrt.f32 %v496_v45 }
 0x2a8   : > { %v737_v46 = vpop.eup %736 }
 0x2a9   : > { %v499_v47 = vmul.f32 %v737_v46, %v481_v31 }
 0x2ab   : > { %v501_v48 = vmul.f32 0.2, %v499_v47 }
 0x2ac   : > { %v739_v49 = vpop.eup %738 }
 0x2ad   : > { %v503_v50 = vmax.f32 %v499_v47, %v501_v48  ;;  %v500_v51 = vmul.f32 %v739_v49, %v482_v33 }
 0x2af   : > { %v645_v52 = vpack.c.bf16 %v503_v50, %v503_v50  ;;  %v502_v53 = vmul.f32 0.2, %v500_v51 }
 0x2b1   : > { %514 = vst.msk [vmem:[%s214_s9] sm:$0xf] %vm513_vm3, %v645_v52  ;;  %v504_v54 = vmax.f32 %v500_v51, %v502_v53 }
 0x2b3   : > { %v646_v55 = vpack.c.bf16 %v504_v54, %v504_v54 }
 0x2b5   : > { %515 = vst.msk [vmem:[%s214_s9 + $0x4] sm:$0xf] %vm513_vm3, %v646_v55 }
 0x2b6 PF: > { %s13_s14 = sadd.s32 1, %s762_s14   ;;  %s857_s12 = smov %s758_s13 }
 0x2b7   : > { %p10_p5 = scmp.ge.s32.totalorder %s13_s14, 4   ;;  %s858_s13 = smov %s860_s15 }
 0x2b9   :  { %12 = sbr.rel (!%p10_p5) target bundleno = 2 (0x2), region = 68 }

// kernel: discriminator_forward.8
= control target key start
LH: loop header
LB: loop body
LE: loop exit
PB: predicated region body
PF: predicated region fallthrough
CT: control target
= control target key end

     0   :  { %s2130_s12 = smov 0   ;;  %s2132_s13 = smov 0   ;;  %s2310_s0 = inlined_call_operand.vmem [shape: bf16[2,16,36], index: 0, kind: input, shape index: {}]   ;;  %s2311_s1 = inlined_call_operand.vmem [shape: bf16[16,32,16], index: 1, kind: input, shape index: {}]   ;;  %s2312_s2 = inlined_call_operand.vmem [shape: f32[1,15], index: 2, kind: input, shape index: {}]   ;;  %s2313_s3 = inlined_call_operand.vmem [shape: bf16[2,32,15], index: 3, kind: output, shape index: {}]  }
   0x1   :  { %s2134_s14 = smov 0  }
   0x2 LB: > { %s25_s15 = sadd.s32 1, %s2089_s13  ;;  %p1644_p0 = scmp.ge.s32.totalorder %s2093_s14, 1  ;;  %s2093_s14 = sphi %s2134_s14, %s13_s14   ;;  %s2089_s13 = sphi %s2132_s13, %s2315_s13   ;;  %s2085_s12 = sphi %s2130_s12, %s2314_s12  }
   0x3   : > { %p27_p1 = scmp.ge.s32.totalorder %s25_s15, 2  ;;  %p162_p2 = scmp.lt.s32.totalorder %s2093_s14, 3 }
   0x5   : > { %s2317_s15 = smov (%p27_p1, %s25_s15), 0  ;;  %p163_p3 = pnand %p1644_p0, %p162_p2 }
   0x6   : > { %p195_p4 = scmp.lt.s32.totalorder (!%p163_p3), %s2085_s12, 1  ;;  %v2031_v0 = vld [vmem:[%s2311_s1 + $0x10] sm:$0xff] (!%p163_p3)   ;;  %vm246_vm0 = vcmask (!%p163_p3), 130048   ;;  %v2033_v1 = vld [vmem:[%s2311_s1 + $0x80] sm:$0xff] (!%p163_p3)   ;;  %s2095_s24 = smov (!%p163_p3), 127   ;;  %v2032_v4 = vld [vmem:[%s2311_s1 + $0x18] sm:$0xff] (!%p163_p3)  }
   0x7   : > { %166 = sbr.rel (%p163_p3) target bundleno = 767 (0x2ff), region = 32  ;;  %1837 = vmatprep.mubr.msk.bf16.mxu1 (!%p163_p3), %vm246_vm0, %v2031_v0  ;;  %1885 = vmatprep.mubr.msk.bf16.mxu0 (!%p163_p3), %vm246_vm0, %v2033_v1  ;;  %s2096_s25 = smov (!%p163_p3), 115   ;;  %v2035_v6 = vld [vmem:[%s2311_s1] sm:$0xff] (!%p163_p3)   ;;  %v2034_v8 = vld [vmem:[%s2311_s1 + $0x88] sm:$0xff] (!%p163_p3)   ;;  %v2037_v10 = vld [vmem:[%s2311_s1 + $0x90] sm:$0xff] (!%p163_p3)   ;;  %vm1457_vm1 = vcmask (!%p163_p3), 121856  }
   0x8   : > { %s2097_s26 = smov (!%p163_p3), 116   ;;  %s2098_s27 = smov (!%p163_p3), 126   ;;  %v2036_v12 = vld [vmem:[%s2311_s1 + $0x8] sm:$0xff] (!%p163_p3)   ;;  %v2039_v13 = vld [vmem:[%s2311_s1 + $0x20] sm:$0xff] (!%p163_p3)   ;;  %v2038_v15 = vld [vmem:[%s2311_s1 + $0x98] sm:$0xff] (!%p163_p3)   ;;  %vm1538_vm2 = vcmask (!%p163_p3), 117760  }
   0x9   : > { %s2099_s28 = smov (!%p163_p3), 114   ;;  %s2100_s29 = smov (!%p163_p3), 125   ;;  %v2041_v16 = vld [vmem:[%s2311_s1 + $0xa0] sm:$0xff] (!%p163_p3)   ;;  %v2040_v18 = vld [vmem:[%s2311_s1 + $0x28] sm:$0xff] (!%p163_p3)   ;;  %v2043_v19 = vld [vmem:[%s2311_s1 + $0x30] sm:$0xff] (!%p163_p3)  }
   0xa   : > { %s2101_s30 = smov (!%p163_p3), 113   ;;  %s2102_s4 = smov (!%p163_p3), 122   ;;  %v2042_v21 = vld [vmem:[%s2311_s1 + $0xa8] sm:$0xff] (!%p163_p3)   ;;  %v2045_v22 = vld [vmem:[%s2311_s1 + $0xb0] sm:$0xff] (!%p163_p3)   ;;  %v2044_v24 = vld [vmem:[%s2311_s1 + $0x38] sm:$0xff] (!%p163_p3)  }
   0xb   : > { %s2103_s5 = smov (!%p163_p3), 110   ;;  %s2104_s6 = smov (!%p163_p3), 121   ;;  %v2047_v25 = vld [vmem:[%s2311_s1 + $0x40] sm:$0xff] (!%p163_p3)   ;;  %v2046_v27 = vld [vmem:[%s2311_s1 + $0xb8] sm:$0xff] (!%p163_p3)   ;;  %v2048_v30 = vld [vmem:[%s2311_s1 + $0x48] sm:$0xff] (!%p163_p3)  }
   0xc   : > { %s2105_s7 = smov (!%p163_p3), 109   ;;  %s2106_s8 = smov (!%p163_p3), 120   ;;  %v2049_v28 = vld [vmem:[%s2311_s1 + $0xc0] sm:$0xff] (!%p163_p3)   ;;  %v2051_v31 = vld [vmem:[%s2311_s1 + $0x50] sm:$0xff] (!%p163_p3)   ;;  %v2050_v33 = vld [vmem:[%s2311_s1 + $0xc8] sm:$0xff] (!%p163_p3)  }
   0xd   : > { %s2107_s9 = smov (!%p163_p3), 108   ;;  %s2108_s10 = smov (!%p163_p3), 119   ;;  %v2053_v34 = vld [vmem:[%s2311_s1 + $0xd0] sm:$0xff] (!%p163_p3)   ;;  %v2052_v36 = vld [vmem:[%s2311_s1 + $0x58] sm:$0xff] (!%p163_p3)   ;;  %v2055_v37 = vld [vmem:[%s2311_s1 + $0x60] sm:$0xff] (!%p163_p3)  }
   0xe   : > { %s2319_s12 = smov (!%p195_p4, %s2085_s12), 1  ;;  %s2109_s11 = smov 107   ;;  %v2054_v39 = vld [vmem:[%s2311_s1 + $0xd8] sm:$0xff]   ;;  %v2057_v40 = vld [vmem:[%s2311_s1 + $0xe0] sm:$0xff]   ;;  %v2056_v42 = vld [vmem:[%s2311_s1 + $0x68] sm:$0xff]  }
   0xf   : > { %s1781_s20 = sshll.u32 %s2319_s12, 3  ;;  %v2059_v43 = vld [vmem:[%s2311_s1 + $0x70] sm:$0xff]   ;;  %v2058_v44 = vld [vmem:[%s2311_s1 + $0xe8] sm:$0xff]   ;;  %v2060_v46 = vld [vmem:[%s2311_s1 + $0x78] sm:$0xff]  }
  0x10   : > { %s199_s23 = scalar_lea.vmem %s2310_s0, %s1781_s20  ;;  %v2061_v45 = vld [vmem:[%s2311_s1 + $0xf0] sm:$0xff]   ;;  %v2062_v47 = vld [vmem:[%s2311_s1 + $0xf8] sm:$0xff]   ;;  %v1774_v55 = vld [vmem:[%s2312_s2] ss:$0 sm:$0xff] }
  0x11   : > { %v2030_v2 = vld [vmem:[%s199_s23] sm:$0xff]  }
  0x12   : > { %243 = vrot.lane.b32.xlu0 %v2030_v2, %s2095_s24  ;;  %922 = vrot.lane.b32.xlu1 %v2030_v2, %s2096_s25 }
  0x16   : > { %845 = vrot.lane.b32.xlu0 %v2030_v2, %s2097_s26  ;;  %383 = vrot.lane.b32.xlu1 %v2030_v2, %s2098_s27 }
  0x1a   : > { %999 = vrot.lane.b32.xlu0 %v2030_v2, %s2099_s28  ;;  %460 = vrot.lane.b32.xlu1 %v2030_v2, %s2100_s29 }
  0x1e   : > { %1076 = vrot.lane.b32.xlu0 %v2030_v2, %s2101_s30  ;;  %537 = vrot.lane.b32.xlu1 %v2030_v2, %s2102_s4 }
  0x22   : > { %1153 = vrot.lane.b32.xlu0 %v2030_v2, %s2103_s5  ;;  %614 = vrot.lane.b32.xlu1 %v2030_v2, %s2104_s6  ;;  %s1782_s5 = sshll.u32 %s2319_s12, 4 }
  0x26   : > { %1230 = vrot.lane.b32.xlu0 %v2030_v2, %s2105_s7  ;;  %691 = vrot.lane.b32.xlu1 %v2030_v2, %s2106_s8  ;;  %s214_s8 = scalar_lea.vmem %s2313_s3, %s1782_s5 }
  0x2a   : > { %1307 = vrot.lane.b32.xlu0 %v2030_v2, %s2107_s9  ;;  %768 = vrot.lane.b32.xlu1 %v2030_v2, %s2108_s10 }
  0x2e   : > { %1384 = vrot.lane.b32.xlu0 %v2030_v2, %s2109_s11 }
  0x84   : > { %v244_v3 = vpop.permute.xlu0 %243  ;;  %v923_v5 = vpop.permute.xlu1 %922 }
  0x85   : > { %1835 = vmatprep.subr.bf16.mxu1 %v244_v3 }
  0x86   : > { %1836 = vmatpush3.bf16.msra.mxu1 %v244_v3 }
  0x87   : > { %1841 = vmatprep.subr.bf16.mxu1 %v2030_v2 }
  0x88   : > { %v846_v7 = vpop.permute.xlu0 %845  ;;  %v384_v9 = vpop.permute.xlu1 %383 }
  0x89   : > { %1838 = vmatmul.mubr.msk.bf16.vlgmr.msra.gmra.mrb[0].mxu1 %vm246_vm0, %v2032_v4  ;;  %1883 = vmatprep.subr.bf16.mxu0 %v846_v7 }
  0x8a   : > { %1884 = vmatpush3.bf16.msra.mxu0 %v846_v7  ;;  %1842 = vmatpush3.bf16.msra.mxu1 %v2030_v2 }
  0x8b   : > { %1889 = vmatprep.subr.bf16.mxu0 %v923_v5  ;;  %1843 = vmatprep.mubr.msk.bf16.mxu1 %vm246_vm0, %v2035_v6 }
  0x8c   : > { %v1000_v11 = vpop.permute.xlu0 %999  ;;  %1847 = vmatprep.subr.bf16.mxu1 %v384_v9  ;;  %v461_v14 = vpop.permute.xlu1 %460 }
  0x8d   : > { %1886 = vmatmul.mubr.msk.bf16.vlgmr.msra.gmra.mrb[0].mxu0 %vm246_vm0, %v2034_v8 }
  0x8e   : > { %1890 = vmatpush3.bf16.msra.mxu0 %v923_v5  ;;  %1891 = vmatprep.mubr.msk.bf16.mxu0 %vm246_vm0, %v2037_v10 }
  0x8f   : > { %1895 = vmatprep.subr.bf16.mxu0 %v1000_v11 }
  0x90   : > { %v1077_v17 = vpop.permute.xlu0 %1076  ;;  %v538_v20 = vpop.permute.xlu1 %537 }
  0x94   : > { %v1154_v23 = vpop.permute.xlu0 %1153  ;;  %v615_v26 = vpop.permute.xlu1 %614 }
  0x95   : > { %1844 = vmatmul.mubr.msk.bf16.vlgmr.msra.gmra.mrb[0].mxu1 %vm246_vm0, %v2036_v12 }
  0x96   : > { %1848 = vmatpush3.bf16.msra.mxu1 %v384_v9  ;;  %1849 = vmatprep.mubr.msk.bf16.mxu1 %vm246_vm0, %v2039_v13 }
  0x97   : > { %1853 = vmatprep.subr.bf16.mxu1 %v461_v14 }
  0x98   : > { %v1231_v29 = vpop.permute.xlu0 %1230  ;;  %v692_v32 = vpop.permute.xlu1 %691 }
  0x99   : > { %1892 = vmatmul.mubr.msk.bf16.vlgmr.msra.gmra.mrb[0].mxu0 %vm246_vm0, %v2038_v15 }
  0x9a   : > { %1896 = vmatpush3.bf16.msra.mxu0 %v1000_v11  ;;  %1897 = vmatprep.mubr.msk.bf16.mxu0 %vm246_vm0, %v2041_v16 }
  0x9b   : > { %1901 = vmatprep.subr.bf16.mxu0 %v1077_v17 }
  0x9c   : > { %v1308_v35 = vpop.permute.xlu0 %1307  ;;  %v769_v38 = vpop.permute.xlu1 %768 }
  0xa0   : > { %v1385_v41 = vpop.permute.xlu0 %1384 }
  0xa1   : > { %1850 = vmatmul.mubr.msk.bf16.vlgmr.msra.gmra.mrb[0].mxu1 %vm246_vm0, %v2040_v18 }
  0xa2   : > { %1854 = vmatpush3.bf16.msra.mxu1 %v461_v14  ;;  %1855 = vmatprep.mubr.msk.bf16.mxu1 %vm246_vm0, %v2043_v19 }
  0xa3   : > { %1859 = vmatprep.subr.bf16.mxu1 %v538_v20 }
  0xa5   : > { %1898 = vmatmul.mubr.msk.bf16.vlgmr.msra.gmra.mrb[0].mxu0 %vm246_vm0, %v2042_v21 }
  0xa6   : > { %1902 = vmatpush3.bf16.msra.mxu0 %v1077_v17  ;;  %1903 = vmatprep.mubr.msk.bf16.mxu0 %vm246_vm0, %v2045_v22 }
  0xa7   : > { %1907 = vmatprep.subr.bf16.mxu0 %v1154_v23 }
  0xad   : > { %1856 = vmatmul.mubr.msk.bf16.vlgmr.msra.gmra.mrb[0].mxu1 %vm246_vm0, %v2044_v24 }
  0xae   : > { %1860 = vmatpush3.bf16.msra.mxu1 %v538_v20  ;;  %1861 = vmatprep.mubr.msk.bf16.mxu1 %vm246_vm0, %v2047_v25 }
  0xaf   : > { %1865 = vmatprep.subr.bf16.mxu1 %v615_v26 }
  0xb1   : > { %1904 = vmatmul.mubr.msk.bf16.vlgmr.msra.gmra.mrb[0].mxu0 %vm246_vm0, %v2046_v27 }
  0xb2   : > { %1908 = vmatpush3.bf16.msra.mxu0 %v1154_v23  ;;  %1909 = vmatprep.mubr.msk.bf16.mxu0 %vm246_vm0, %v2049_v28 }
  0xb3   : > { %1913 = vmatprep.subr.bf16.mxu0 %v1231_v29 }
  0xb9   : > { %1862 = vmatmul.mubr.msk.bf16.vlgmr.msra.gmra.mrb[0].mxu1 %vm246_vm0, %v2048_v30 }
  0xba   : > { %1866 = vmatpush3.bf16.msra.mxu1 %v615_v26  ;;  %1867 = vmatprep.mubr.msk.bf16.mxu1 %vm246_vm0, %v2051_v31 }
  0xbb   : > { %1871 = vmatprep.subr.bf16.mxu1 %v692_v32 }
  0xbd   : > { %1910 = vmatmul.mubr.msk.bf16.vlgmr.msra.gmra.mrb[0].mxu0 %vm246_vm0, %v2050_v33 }
  0xbe   : > { %1914 = vmatpush3.bf16.msra.mxu0 %v1231_v29  ;;  %1915 = vmatprep.mubr.msk.bf16.mxu0 %vm246_vm0, %v2053_v34 }
  0xbf   : > { %1919 = vmatprep.subr.bf16.mxu0 %v1308_v35 }
  0xc5   : > { %1868 = vmatmul.mubr.msk.bf16.vlgmr.msra.gmra.mrb[0].mxu1 %vm246_vm0, %v2052_v36 }
  0xc6   : > { %1872 = vmatpush3.bf16.msra.mxu1 %v692_v32  ;;  %1873 = vmatprep.mubr.msk.bf16.mxu1 %vm246_vm0, %v2055_v37 }
  0xc7   : > { %1877 = vmatprep.subr.bf16.mxu1 %v769_v38 }
  0xc9   : > { %1916 = vmatmul.mubr.msk.bf16.vlgmr.msra.gmra.mrb[0].mxu0 %vm246_vm0, %v2054_v39 }
  0xca   : > { %1920 = vmatpush3.bf16.msra.mxu0 %v1308_v35  ;;  %1921 = vmatprep.mubr.msk.bf16.mxu0 %vm246_vm0, %v2057_v40 }
  0xcb   : > { %1925 = vmatprep.subr.bf16.mxu0 %v1385_v41 }
  0xd1   : > { %1874 = vmatmul.mubr.msk.bf16.vlgmr.msra.gmra.mrb[0].mxu1 %vm246_vm0, %v2056_v42 }
  0xd2   : > { %1878 = vmatpush3.bf16.msra.mxu1 %v769_v38  ;;  %1879 = vmatprep.mubr.msk.bf16.mxu1 %vm246_vm0, %v2059_v43 }
  0xd5   : > { %1922 = vmatmul.mubr.msk.bf16.vlgmr.msra.gmra.mrb[0].mxu0 %vm246_vm0, %v2058_v44 }
  0xd6   : > { %1926 = vmatpush3.bf16.msra.mxu0 %v1385_v41  ;;  %1927 = vmatprep.mubr.msk.bf16.mxu0 %vm246_vm0, %v2061_v45 }
  0xdd   : > { %1880 = vmatmul.mubr.msk.bf16.vlgmr.msra.gmra.mrb[0].mxu1 %vm246_vm0, %v2060_v46 }
  0xe1   : > { %1928 = vmatmul.mubr.msk.bf16.vlgmr.msra.gmra.mrb[0].mxu0 %vm246_vm0, %v2062_v47 }
 0x1b0   : > { %v1881_v48 = vpop.f32.mrb[0].mxu1 }
 0x1b1   : > { %v811_v49 = vpop.f32.mrb[1].mxu1 }
 0x1b2   : > { %v1882_v50 = vpop.f32.mrb[2].mxu1 }
 0x1b3   : > { %v814_v51 = vpop.f32.mrb[3].mxu1 }
 0x1b4   : > { %v1929_v52 = vpop.f32.mrb[0].mxu0 }
 0x1b5   : > { %v1931_v53 = vadd.f32 %v1929_v52, %v1881_v48  ;;  %v1427_v54 = vpop.f32.mrb[1].mxu0 }
 0x1b6   : > { %v1932_v56 = vadd.f32 %v1427_v54, %v811_v49  ;;  %v1930_v57 = vpop.f32.mrb[2].mxu0 }
 0x1b7   : > { %v1933_v58 = vadd.f32 %v1930_v57, %v1882_v50  ;;  %v1430_v59 = vpop.f32.mrb[3].mxu0  ;;  %v1455_v2 = vmul.f32 %v1931_v53, %v1774_v55 }
 0x1b8   : > { %v1934_v60 = vadd.f32 %v1430_v59, %v814_v51  ;;  %v1453_v61 = vmul.f32 %v1932_v56, %v1774_v55 }
 0x1b9   : > { %v1456_v0 = vmul.f32 %v1933_v58, %v1774_v55  ;;  %v1464_v4 = vsel %vm1457_vm1, %v1455_v2, 0.0 }
 0x1ba   : > { %v1458_v62 = vsel %vm1457_vm1, %v1453_v61, 0.0  ;;  %v1454_v63 = vmul.f32 %v1934_v60, %v1774_v55 }
 0x1bb   : > { %1459 = vadd.xlane.f32.xlu1 %v1458_v62  ;;  %v1467_v3 = vsel %vm1457_vm1, %v1456_v0, 0.0 }
 0x1bc   : > { %v1461_v1 = vsel %vm1457_vm1, %v1454_v63, 0.0 }
 0x1bd   : > { %1462 = vadd.xlane.f32.xlu0 %v1461_v1 }
 0x1bf   : > { %1468 = vadd.xlane.f32.xlu1 %v1467_v3 }
 0x1c1   : > { %1465 = vadd.xlane.f32.xlu0 %v1464_v4 }
 0x248   : > { %v1460_v5 = vpop.xlane.xlu1 %1459 }
 0x249   : > { %v1470_v6 = vmul.f32 0.11111111, %v1460_v5 }
 0x24a   : > { %v1463_v7 = vpop.xlane.xlu0 %1462 }
 0x24b   : > { %v1474_v8 = vsub.f32 %v1932_v56, %v1470_v6  ;;  %v1471_v9 = vmul.f32 0.11111111, %v1463_v7 }
 0x24c   : > { %v1469_v10 = vpop.xlane.xlu1 %1468 }
 0x24d   : > { %v1475_v11 = vsub.f32 %v1934_v60, %v1471_v9  ;;  %v1473_v12 = vmul.f32 0.11111111, %v1469_v10  ;;  %v1478_v13 = vmul.f32 %v1774_v55, %v1474_v8 }
 0x24e   : > { %v1466_v14 = vpop.xlane.xlu0 %1465 }
 0x24f   : > { %v1477_v15 = vsub.f32 %v1933_v58, %v1473_v12  ;;  %v1472_v16 = vmul.f32 0.11111111, %v1466_v14  ;;  %v1482_v17 = vmul.f32 %v1478_v13, %v1478_v13  ;;  %v1479_v18 = vmul.f32 %v1774_v55, %v1475_v11 }
 0x251   : > { %v1476_v19 = vsub.f32 %v1931_v53, %v1472_v16  ;;  %v1486_v20 = vsel %vm1457_vm1, %v1482_v17, 0.0  ;;  %v1483_v21 = vmul.f32 %v1479_v18, %v1479_v18  ;;  %v1481_v22 = vmul.f32 %v1774_v55, %v1477_v15 }
 0x252   : > { %1487 = vadd.xlane.f32.xlu0 %v1486_v20 }
 0x253   : > { %v1489_v23 = vsel %vm1457_vm1, %v1483_v21, 0.0  ;;  %v1485_v24 = vmul.f32 %v1481_v22, %v1481_v22  ;;  %v1480_v25 = vmul.f32 %v1774_v55, %v1476_v19 }
 0x254   : > { %1490 = vadd.xlane.f32.xlu1 %v1489_v23 }
 0x255   : > { %v1484_v26 = vmul.f32 %v1480_v25, %v1480_v25  ;;  %v1495_v27 = vsel %vm1457_vm1, %v1485_v24, 0.0 }
 0x257   : > { %v1492_v28 = vsel %vm1457_vm1, %v1484_v26, 0.0 }
 0x258   : > { %1496 = vadd.xlane.f32.xlu1 %v1495_v27  ;;  %1493 = vadd.xlane.f32.xlu0 %v1492_v28 }
 0x2df   : > { %v1488_v29 = vpop.xlane.xlu0 %1487 }
 0x2e0   : > { %v1498_v30 = vmul.f32 0.11111111, %v1488_v29 }
 0x2e1   : > { %v1491_v31 = vpop.xlane.xlu1 %1490 }
 0x2e2   : > { %v1502_v32 = vadd.f32 1e-05, %v1498_v30  ;;  %v1499_v33 = vmul.f32 0.11111111, %v1491_v31 }
 0x2e4   : > { %2063 = vrsqrt.f32 %v1502_v32  ;;  %v1503_v34 = vadd.f32 1e-05, %v1499_v33 }
 0x2e5   : > { %v1497_v35 = vpop.xlane.xlu1 %1496  ;;  %v1494_v36 = vpop.xlane.xlu0 %1493 }
 0x2e6   : > { %2065 = vrsqrt.f32 %v1503_v34  ;;  %v1501_v37 = vmul.f32 0.11111111, %v1497_v35  ;;  %v1500_v38 = vmul.f32 0.11111111, %v1494_v36 }
 0x2e8   : > { %v1505_v39 = vadd.f32 1e-05, %v1501_v37  ;;  %v1504_v40 = vadd.f32 1e-05, %v1500_v38 }
 0x2ea   : > { %2067 = vrsqrt.f32 %v1505_v39 }
 0x2eb   : > { %2069 = vrsqrt.f32 %v1504_v40 }
 0x2ee   : > { %v2064_v41 = vpop.eup %2063 }
 0x2ef   : > { %v1510_v42 = vmul.f32 %v2064_v41, %v1474_v8 }
 0x2f0   : > { %v2066_v43 = vpop.eup %2065 }
 0x2f1   : > { %v1514_v44 = vmul.f32 0.2, %v1510_v42  ;;  %v1511_v45 = vmul.f32 %v2066_v43, %v1475_v11 }
 0x2f3   : > { %v1518_v46 = vmax.f32 %v1510_v42, %v1514_v44  ;;  %v1515_v47 = vmul.f32 0.2, %v1511_v45 }
 0x2f4   : > { %v2068_v48 = vpop.eup %2067 }
 0x2f5   : > { %v2070_v49 = vpop.eup %2069  ;;  %v1783_v50 = vpack.c.bf16 %v1518_v46, %v1518_v46  ;;  %v1519_v51 = vmax.f32 %v1511_v45, %v1515_v47  ;;  %v1513_v52 = vmul.f32 %v2068_v48, %v1477_v15 }
 0x2f6   : > { %v1512_v53 = vmul.f32 %v2070_v49, %v1476_v19 }
 0x2f7   : > { %1539 = vst.msk [vmem:[%s214_s8] sm:$0xf] %vm1538_vm2, %v1783_v50  ;;  %v1784_v54 = vpack.c.bf16 %v1519_v51, %v1519_v51  ;;  %v1517_v55 = vmul.f32 0.2, %v1513_v52 }
 0x2f8   : > { %v1516_v56 = vmul.f32 0.2, %v1512_v53 }
 0x2f9   : > { %1540 = vst.msk [vmem:[%s214_s8 + $0x4] sm:$0xf] %vm1538_vm2, %v1784_v54  ;;  %v1521_v57 = vmax.f32 %v1513_v52, %v1517_v55 }
 0x2fa   : > { %v1520_v58 = vmax.f32 %v1512_v53, %v1516_v56 }
 0x2fb   : > { %v1786_v59 = vpack.c.bf16 %v1521_v57, %v1521_v57 }
 0x2fc   : > { %v1785_v60 = vpack.c.bf16 %v1520_v58, %v1520_v58 }
 0x2fd   : > { %1542 = vst.msk [vmem:[%s214_s8 + $0xc] sm:$0xf] %vm1538_vm2, %v1786_v59 }
 0x2fe   : > { %1541 = vst.msk [vmem:[%s214_s8 + $0x8] sm:$0xf] %vm1538_vm2, %v1785_v60 }
 0x2ff PF: > { %s13_s14 = sadd.s32 1, %s2093_s14   ;;  %s2314_s12 = smov %s2089_s13 }
 0x300   : > { %p10_p5 = scmp.ge.s32.totalorder %s13_s14, 4   ;;  %s2315_s13 = smov %s2317_s15 }
 0x302   :  { %12 = sbr.rel (!%p10_p5) target bundleno = 2 (0x2), region = 80 }

// kernel: discriminator_forward.9
= control target key start
LH: loop header
LB: loop body
LE: loop exit
PB: predicated region body
PF: predicated region fallthrough
CT: control target
= control target key end

     0   :  { %s1492_s14 = smov 0   ;;  %s1494_s15 = smov 0   ;;  %s1657_s0 = inlined_call_operand.vmem [shape: bf16[2,32,25], index: 0, kind: input, shape index: {}]   ;;  %s1658_s1 = inlined_call_operand.vmem [shape: bf16[16,1,32], index: 1, kind: input, shape index: {}]   ;;  %s1659_s2 = inlined_call_operand.<no memory space> [shape: f32[1,1], index: 2, kind: input, shape index: {}]   ;;  %s1660_s3 = inlined_call_operand.vmem [shape: f32[2,1,7], index: 3, kind: output, shape index: {}]  }
   0x1   :  { %v8_v0 = vstv %s1659_s2  ;;  %s1496_s16 = smov 0  }
   0x2   :  { %9 = vst [vmem:[#allocation2] sm:$0x1] %v8_v0 }
   0x3 LB: > { %s27_s2 = sadd.s32 1, %s1445_s15  ;;  %p1167_p0 = scmp.ge.s32.totalorder %s1449_s16, 1  ;;  %s1449_s16 = sphi %s1496_s16, %s15_s16   ;;  %s1445_s15 = sphi %s1494_s15, %s1662_s15   ;;  %s1441_s14 = sphi %s1492_s14, %s1661_s14  }
   0x4   : > { %p29_p1 = scmp.ge.s32.totalorder %s27_s2, 2  ;;  %p169_p2 = scmp.lt.s32.totalorder %s1449_s16, 3 }
   0x6   : > { %s1664_s2 = smov (%p29_p1, %s27_s2), 0  ;;  %p170_p3 = pnand %p1167_p0, %p169_p2 }
   0x7   : > { %p200_p4 = scmp.lt.s32.totalorder (!%p170_p3), %s1441_s14, 1  ;;  %v1451_v1 = vmov (!%p170_p3), 0.0   ;;  %vm1452_vm0 = vmmov (!%p170_p3), 0   ;;  %s1453_s21 = smov (!%p170_p3), 127   ;;  %vm241_vm1 = vcmask (!%p170_p3), 261120   ;;  %v1466_v5 = vmov (!%p170_p3), 0  }
   0x8   : > { %173 = sbr.rel (%p170_p3) target bundleno = 416 (0x1a0), region = 32  ;;  %1254 = vmatprep.subr.bf16.mxu0 (!%p170_p3), %v1451_v1  ;;  %1262 = vmatprep.subr.bf16.mxu1 (!%p170_p3), %v1451_v1  ;;  %s1454_s22 = smov (!%p170_p3), 126   ;;  %v222_v4 = vld [vmem:[%s1658_s1] sm:$0x1] (!%p170_p3)  ;;  %v1170_v11 = vld [vmem:[%s1658_s1 + $0x1] sm:$0x1] (!%p170_p3) }
   0x9   : > { %1258 = vmatprep.mubr.msk.bf16.mxu0 (!%p170_p3), %vm1452_vm0, %v1451_v1  ;;  %1266 = vmatprep.mubr.msk.bf16.mxu1 (!%p170_p3), %vm1452_vm0, %v1451_v1  ;;  %s1455_s23 = smov (!%p170_p3), 125   ;;  %s1456_s26 = smov (!%p170_p3), 122   ;;  %v1058_v6 = vld [vmem:[#allocation2] sm:$0x1] (!%p170_p3)  ;;  %v1177_v14 = vld [vmem:[%s1658_s1 + $0x3] sm:$0x1] (!%p170_p3) }
   0xa   : > { %s1457_s27 = smov (!%p170_p3), 123   ;;  %s1458_s28 = smov (!%p170_p3), 120   ;;  %1424 = vset.pattern.permute.xlu0 (!%p170_p3), %v1466_v5  ;;  %v1175_v17 = vld [vmem:[%s1658_s1 + $0x2] sm:$0x1] (!%p170_p3)  ;;  %v1181_v20 = vld [vmem:[%s1658_s1 + $0x5] sm:$0x1] (!%p170_p3) }
   0xb   : > { %s1459_s29 = smov (!%p170_p3), 121   ;;  %s1460_s30 = smov (!%p170_p3), 117   ;;  %v1179_v23 = vld [vmem:[%s1658_s1 + $0x4] sm:$0x1] (!%p170_p3)  ;;  %v1185_v26 = vld [vmem:[%s1658_s1 + $0x7] sm:$0x1] (!%p170_p3) }
   0xc   : > { %s1461_s4 = smov (!%p170_p3), 118   ;;  %s1462_s5 = smov (!%p170_p3), 115   ;;  %v1183_v29 = vld [vmem:[%s1658_s1 + $0x6] sm:$0x1] (!%p170_p3)  ;;  %v1189_v32 = vld [vmem:[%s1658_s1 + $0x9] sm:$0x1] (!%p170_p3) }
   0xd   : > { %s1463_s6 = smov (!%p170_p3), 116   ;;  %s1464_s7 = smov (!%p170_p3), 112   ;;  %v1187_v35 = vld [vmem:[%s1658_s1 + $0x8] sm:$0x1] (!%p170_p3)  ;;  %v1193_v38 = vld [vmem:[%s1658_s1 + $0xb] sm:$0x1] (!%p170_p3) }
   0xe   : > { %s1465_s8 = smov (!%p170_p3), 113   ;;  %s1467_s9 = smov (!%p170_p3), 110   ;;  %v1191_v41 = vld [vmem:[%s1658_s1 + $0xa] sm:$0x1] (!%p170_p3)  ;;  %v1197_v44 = vld [vmem:[%s1658_s1 + $0xd] sm:$0x1] (!%p170_p3) }
   0xf   : > { %s1666_s14 = smov (!%p200_p4, %s1441_s14), 1  ;;  %s1468_s10 = smov 111   ;;  %v1195_v47 = vld [vmem:[%s1658_s1 + $0xc] sm:$0x1]  ;;  %v1201_v49 = vld [vmem:[%s1658_s1 + $0xf] sm:$0x1] }
  0x10   : > { %s1205_s17 = sshll.u32 %s1666_s14, 4  ;;  %v1199_v51 = vld [vmem:[%s1658_s1 + $0xe] sm:$0x1]  ;;  %vm1069_vm2 = vcmask 49152  }
  0x11   : > { %s204_s20 = scalar_lea.vmem %s1657_s0, %s1205_s17 }
  0x12   : > { %v1425_v2 = vld [vmem:[%s204_s20] sm:$0xff]   ;;  %v1426_v3 = vld [vmem:[%s204_s20 + $0x8] sm:$0xff]  }
  0x13   : > { %235 = vrot.lane.b32.xlu0 %v1425_v2, %s1453_s21  ;;  %332 = vrot.lane.b32.xlu1 %v1425_v2, %s1454_s22 }
  0x14   : > { %1263 = vmatpush3.bf16.msra.mxu1 %v1425_v2 }
  0x15   : > { %1264 = vmatprep.subr.bf16.mxu1 %v1451_v1 }
  0x17   : > { %237 = vrot.lane.b32.xlu0 %v1426_v3, %s1453_s21  ;;  %384 = vrot.lane.b32.xlu1 %v1425_v2, %s1455_s23 }
  0x18   : > { %1265 = vmatpush3.bf16.msra.mxu1 %v1426_v3 }
  0x19   : > { %1278 = vmatprep.subr.bf16.mxu1 %v1451_v1 }
  0x1b   : > { %386 = vrot.lane.b32.xlu1 %v1426_v3, %s1455_s23  ;;  %334 = vrot.lane.b32.xlu0 %v1426_v3, %s1454_s22  ;;  %s216_s22 = scalar_lea.vmem %s1660_s3, %s1666_s14 }
  0x1c   : > { %1267 = vmatmul.mubr.msk.bf16.vlgmr.msra.gmra.mrb[0].mxu1 %vm241_vm1, %v222_v4 }
  0x1d   : > { %1282 = vmatprep.mubr.msk.bf16.mxu1 %vm1452_vm0, %v1451_v1 }
  0x1f   : > { %488 = vrot.lane.b32.xlu1 %v1425_v2, %s1456_s26  ;;  %436 = vrot.lane.b32.xlu0 %v1425_v2, %s1457_s27 }
  0x23   : > { %490 = vrot.lane.b32.xlu1 %v1426_v3, %s1456_s26  ;;  %438 = vrot.lane.b32.xlu0 %v1426_v3, %s1457_s27 }
  0x27   : > { %592 = vrot.lane.b32.xlu1 %v1425_v2, %s1458_s28  ;;  %540 = vrot.lane.b32.xlu0 %v1425_v2, %s1459_s29 }
  0x2b   : > { %594 = vrot.lane.b32.xlu1 %v1426_v3, %s1458_s28  ;;  %542 = vrot.lane.b32.xlu0 %v1426_v3, %s1459_s29 }
  0x2f   : > { %696 = vrot.lane.b32.xlu1 %v1425_v2, %s1460_s30  ;;  %644 = vrot.lane.b32.xlu0 %v1425_v2, %s1461_s4 }
  0x33   : > { %698 = vrot.lane.b32.xlu1 %v1426_v3, %s1460_s30  ;;  %646 = vrot.lane.b32.xlu0 %v1426_v3, %s1461_s4 }
  0x37   : > { %800 = vrot.lane.b32.xlu1 %v1425_v2, %s1462_s5  ;;  %748 = vrot.lane.b32.xlu0 %v1425_v2, %s1463_s6 }
  0x3b   : > { %802 = vrot.lane.b32.xlu1 %v1426_v3, %s1462_s5  ;;  %750 = vrot.lane.b32.xlu0 %v1426_v3, %s1463_s6 }
  0x3f   : > { %904 = vrot.lane.b32.xlu1 %v1425_v2, %s1464_s7  ;;  %852 = vrot.lane.b32.xlu0 %v1425_v2, %s1465_s8 }
  0x43   : > { %906 = vrot.lane.b32.xlu1 %v1426_v3, %s1464_s7  ;;  %854 = vrot.lane.b32.xlu0 %v1426_v3, %s1465_s8 }
  0x47   : > { %1008 = vrot.lane.b32.xlu1 %v1425_v2, %s1467_s9  ;;  %956 = vrot.lane.b32.xlu0 %v1425_v2, %s1468_s10 }
  0x4b   : > { %1010 = vrot.lane.b32.xlu1 %v1426_v3, %s1467_s9  ;;  %958 = vrot.lane.b32.xlu0 %v1426_v3, %s1468_s10 }
  0x4f   : > { %1061 = vperm.xlu0 %1424, %v1058_v6  }
  0x85   : > { %v236_v7 = vpop.permute.xlu0 %235  ;;  %v333_v8 = vpop.permute.xlu1 %332 }
  0x86   : > { %1255 = vmatpush3.bf16.msra.mxu0 %v236_v7 }
  0x87   : > { %1256 = vmatprep.subr.bf16.mxu0 %v1451_v1 }
  0x89   : > { %v238_v9 = vpop.permute.xlu0 %237  ;;  %v385_v10 = vpop.permute.xlu1 %384 }
  0x8a   : > { %1257 = vmatpush3.bf16.msra.mxu0 %v238_v9  ;;  %1279 = vmatpush3.bf16.msra.mxu1 %v385_v10 }
  0x8b   : > { %1270 = vmatprep.subr.bf16.mxu0 %v1451_v1  ;;  %1280 = vmatprep.subr.bf16.mxu1 %v1451_v1 }
  0x8d   : > { %1259 = vmatmul.mubr.msk.bf16.vlgmr.msra.gmra.mrb[0].mxu0 %vm241_vm1, %v1170_v11  ;;  %v387_v12 = vpop.permute.xlu1 %386  ;;  %v335_v13 = vpop.permute.xlu0 %334 }
  0x8e   : > { %1271 = vmatpush3.bf16.msra.mxu0 %v333_v8  ;;  %1281 = vmatpush3.bf16.msra.mxu1 %v387_v12 }
  0x8f   : > { %1272 = vmatprep.subr.bf16.mxu0 %v1451_v1  ;;  %1274 = vmatprep.mubr.msk.bf16.mxu0 %vm1452_vm0, %v1451_v1 }
  0x90   : > { %1294 = vmatprep.subr.bf16.mxu1 %v1451_v1 }
  0x91   : > { %v489_v15 = vpop.permute.xlu1 %488  ;;  %v437_v16 = vpop.permute.xlu0 %436  ;;  %1283 = vmatmul.mubr.msk.bf16.vlgmr.msra.gmra.mrb[4].mxu1 %vm241_vm1, %v1177_v14 }
  0x92   : > { %1273 = vmatpush3.bf16.msra.mxu0 %v335_v13  ;;  %1295 = vmatpush3.bf16.msra.mxu1 %v489_v15 }
  0x93   : > { %1286 = vmatprep.subr.bf16.mxu0 %v1451_v1  ;;  %1296 = vmatprep.subr.bf16.mxu1 %v1451_v1 }
  0x94   : > { %1298 = vmatprep.mubr.msk.bf16.mxu1 %vm1452_vm0, %v1451_v1 }
  0x95   : > { %1275 = vmatmul.mubr.msk.bf16.vlgmr.msra.gmra.mrb[4].mxu0 %vm241_vm1, %v1175_v17  ;;  %v491_v18 = vpop.permute.xlu1 %490  ;;  %v439_v19 = vpop.permute.xlu0 %438 }
  0x96   : > { %1287 = vmatpush3.bf16.msra.mxu0 %v437_v16  ;;  %1297 = vmatpush3.bf16.msra.mxu1 %v491_v18 }
  0x97   : > { %1288 = vmatprep.subr.bf16.mxu0 %v1451_v1  ;;  %1290 = vmatprep.mubr.msk.bf16.mxu0 %vm1452_vm0, %v1451_v1 }
  0x98   : > { %1310 = vmatprep.subr.bf16.mxu1 %v1451_v1 }
  0x99   : > { %v593_v21 = vpop.permute.xlu1 %592  ;;  %v541_v22 = vpop.permute.xlu0 %540  ;;  %1299 = vmatmul.mubr.msk.bf16.vlgmr.msra.gmra.mrb[8].mxu1 %vm241_vm1, %v1181_v20 }
  0x9a   : > { %1289 = vmatpush3.bf16.msra.mxu0 %v439_v19  ;;  %1311 = vmatpush3.bf16.msra.mxu1 %v593_v21 }
  0x9b   : > { %1302 = vmatprep.subr.bf16.mxu0 %v1451_v1  ;;  %1312 = vmatprep.subr.bf16.mxu1 %v1451_v1 }
  0x9c   : > { %1314 = vmatprep.mubr.msk.bf16.mxu1 %vm1452_vm0, %v1451_v1 }
  0x9d   : > { %1291 = vmatmul.mubr.msk.bf16.vlgmr.msra.gmra.mrb[8].mxu0 %vm241_vm1, %v1179_v23  ;;  %v595_v24 = vpop.permute.xlu1 %594  ;;  %v543_v25 = vpop.permute.xlu0 %542 }
  0x9e   : > { %1303 = vmatpush3.bf16.msra.mxu0 %v541_v22  ;;  %1313 = vmatpush3.bf16.msra.mxu1 %v595_v24 }
  0x9f   : > { %1304 = vmatprep.subr.bf16.mxu0 %v1451_v1  ;;  %1306 = vmatprep.mubr.msk.bf16.mxu0 %vm1452_vm0, %v1451_v1 }
  0xa0   : > { %1326 = vmatprep.subr.bf16.mxu1 %v1451_v1 }
  0xa1   : > { %v697_v27 = vpop.permute.xlu1 %696  ;;  %v645_v28 = vpop.permute.xlu0 %644  ;;  %1315 = vmatmul.mubr.msk.bf16.vlgmr.msra.gmra.mrb[12].mxu1 %vm241_vm1, %v1185_v26 }
  0xa2   : > { %1305 = vmatpush3.bf16.msra.mxu0 %v543_v25  ;;  %1327 = vmatpush3.bf16.msra.mxu1 %v697_v27 }
  0xa3   : > { %1318 = vmatprep.subr.bf16.mxu0 %v1451_v1  ;;  %1328 = vmatprep.subr.bf16.mxu1 %v1451_v1 }
  0xa4   : > { %1330 = vmatprep.mubr.msk.bf16.mxu1 %vm1452_vm0, %v1451_v1 }
  0xa5   : > { %1307 = vmatmul.mubr.msk.bf16.vlgmr.msra.gmra.mrb[12].mxu0 %vm241_vm1, %v1183_v29  ;;  %v699_v30 = vpop.permute.xlu1 %698  ;;  %v647_v31 = vpop.permute.xlu0 %646 }
  0xa6   : > { %1319 = vmatpush3.bf16.msra.mxu0 %v645_v28  ;;  %1329 = vmatpush3.bf16.msra.mxu1 %v699_v30 }
  0xa7   : > { %1320 = vmatprep.subr.bf16.mxu0 %v1451_v1  ;;  %1322 = vmatprep.mubr.msk.bf16.mxu0 %vm1452_vm0, %v1451_v1 }
  0xa8   : > { %1342 = vmatprep.subr.bf16.mxu1 %v1451_v1 }
  0xa9   : > { %v801_v33 = vpop.permute.xlu1 %800  ;;  %v749_v34 = vpop.permute.xlu0 %748  ;;  %1331 = vmatmul.mubr.msk.bf16.vlgmr.msra.gmra.mrb[16].mxu1 %vm241_vm1, %v1189_v32 }
  0xaa   : > { %1321 = vmatpush3.bf16.msra.mxu0 %v647_v31  ;;  %1343 = vmatpush3.bf16.msra.mxu1 %v801_v33 }
  0xab   : > { %1334 = vmatprep.subr.bf16.mxu0 %v1451_v1  ;;  %1344 = vmatprep.subr.bf16.mxu1 %v1451_v1 }
  0xac   : > { %1346 = vmatprep.mubr.msk.bf16.mxu1 %vm1452_vm0, %v1451_v1 }
  0xad   : > { %1323 = vmatmul.mubr.msk.bf16.vlgmr.msra.gmra.mrb[16].mxu0 %vm241_vm1, %v1187_v35  ;;  %v803_v36 = vpop.permute.xlu1 %802  ;;  %v751_v37 = vpop.permute.xlu0 %750 }
  0xae   : > { %1335 = vmatpush3.bf16.msra.mxu0 %v749_v34  ;;  %1345 = vmatpush3.bf16.msra.mxu1 %v803_v36 }
  0xaf   : > { %1336 = vmatprep.subr.bf16.mxu0 %v1451_v1  ;;  %1338 = vmatprep.mubr.msk.bf16.mxu0 %vm1452_vm0, %v1451_v1 }
  0xb0   : > { %1358 = vmatprep.subr.bf16.mxu1 %v1451_v1 }
  0xb1   : > { %v905_v39 = vpop.permute.xlu1 %904  ;;  %v853_v40 = vpop.permute.xlu0 %852  ;;  %1347 = vmatmul.mubr.msk.bf16.vlgmr.msra.gmra.mrb[20].mxu1 %vm241_vm1, %v1193_v38 }
  0xb2   : > { %1337 = vmatpush3.bf16.msra.mxu0 %v751_v37  ;;  %1359 = vmatpush3.bf16.msra.mxu1 %v905_v39 }
  0xb3   : > { %1350 = vmatprep.subr.bf16.mxu0 %v1451_v1  ;;  %1360 = vmatprep.subr.bf16.mxu1 %v1451_v1 }
  0xb4   : > { %1362 = vmatprep.mubr.msk.bf16.mxu1 %vm1452_vm0, %v1451_v1 }
  0xb5   : > { %1339 = vmatmul.mubr.msk.bf16.vlgmr.msra.gmra.mrb[20].mxu0 %vm241_vm1, %v1191_v41  ;;  %v907_v42 = vpop.permute.xlu1 %906  ;;  %v855_v43 = vpop.permute.xlu0 %854 }
  0xb6   : > { %1351 = vmatpush3.bf16.msra.mxu0 %v853_v40  ;;  %1361 = vmatpush3.bf16.msra.mxu1 %v907_v42 }
  0xb7   : > { %1352 = vmatprep.subr.bf16.mxu0 %v1451_v1  ;;  %1354 = vmatprep.mubr.msk.bf16.mxu0 %vm1452_vm0, %v1451_v1 }
  0xb8   : > { %1374 = vmatprep.subr.bf16.mxu1 %v1451_v1 }
  0xb9   : > { %v1009_v45 = vpop.permute.xlu1 %1008  ;;  %v957_v46 = vpop.permute.xlu0 %956  ;;  %1363 = vmatmul.mubr.msk.bf16.vlgmr.msra.gmra.mrb[24].mxu1 %vm241_vm1, %v1197_v44 }
  0xba   : > { %1353 = vmatpush3.bf16.msra.mxu0 %v855_v43  ;;  %1375 = vmatpush3.bf16.msra.mxu1 %v1009_v45 }
  0xbb   : > { %1366 = vmatprep.subr.bf16.mxu0 %v1451_v1  ;;  %1376 = vmatprep.subr.bf16.mxu1 %v1451_v1 }
  0xbc   : > { %1378 = vmatprep.mubr.msk.bf16.mxu1 %vm1452_vm0, %v1451_v1 }
  0xbd   : > { %1355 = vmatmul.mubr.msk.bf16.vlgmr.msra.gmra.mrb[24].mxu0 %vm241_vm1, %v1195_v47  ;;  %v1011_v48 = vpop.permute.xlu1 %1010  ;;  %v959_v50 = vpop.permute.xlu0 %958 }
  0xbe   : > { %1367 = vmatpush3.bf16.msra.mxu0 %v957_v46  ;;  %1377 = vmatpush3.bf16.msra.mxu1 %v1011_v48 }
  0xbf   : > { %1368 = vmatprep.subr.bf16.mxu0 %v1451_v1  ;;  %1370 = vmatprep.mubr.msk.bf16.mxu0 %vm1452_vm0, %v1451_v1 }
  0xc1   : > { %1379 = vmatmul.mubr.msk.bf16.vlgmr.msra.gmra.mrb[28].mxu1 %vm241_vm1, %v1201_v49  ;;  %v1064_v49 = vlaneseq }
  0xc2   : > { %1369 = vmatpush3.bf16.msra.mxu0 %v959_v50 }
  0xc5   : > { %1371 = vmatmul.mubr.msk.bf16.vlgmr.msra.gmra.mrb[28].mxu0 %vm241_vm1, %v1199_v51 }
  0xef   : > { %v324_v52 = vpop.f32.mrb[0].mxu1 }
  0xf0   : > { %v1268_v53 = vpop.f32.mrb[1].mxu1 }
  0xf1   : > { %v327_v54 = vpop.f32.mrb[2].mxu1 }
  0xf2   : > { %v1269_v55 = vpop.f32.mrb[3].mxu1 }
  0xf3   : > { %v1065_v55 = vshrl.u32 %v1064_v49, 7 }
 0x160   : > { %v279_v56 = vpop.f32.mrb[0].mxu0 }
 0x161   : > { %v325_v57 = vadd.f32 %v324_v52, %v279_v56  ;;  %v1260_v58 = vpop.f32.mrb[1].mxu0 }
 0x162   : > { %v282_v59 = vpop.f32.mrb[2].mxu0 }
 0x163   : > { %v1261_v60 = vpop.f32.mrb[3].mxu0 }
 0x164   : > { %v427_v61 = vpop.f32.mrb[4].mxu1 }
 0x165   : > { %v1284_v62 = vpop.f32.mrb[5].mxu1 }
 0x166   : > { %v430_v63 = vpop.f32.mrb[6].mxu1  ;;  %v1062_v62 = vpop.permute.xlu0 %1061 }
 0x167   : > { %v1285_v0 = vpop.f32.mrb[7].mxu1 }
 0x168   : > { %v375_v1 = vpop.f32.mrb[4].mxu0 }
 0x169   : > { %v381_v2 = vadd.f32 %v375_v1, %v325_v57  ;;  %v1276_v3 = vpop.f32.mrb[5].mxu0 }
 0x16a   : > { %v378_v4 = vpop.f32.mrb[6].mxu0 }
 0x16b   : > { %v433_v5 = vadd.f32 %v427_v61, %v381_v2  ;;  %v1277_v6 = vpop.f32.mrb[7].mxu0  ;;  %v1066_v61 = vsub.s32 0, %v1065_v55 }
 0x16c   : > { %v531_v7 = vpop.f32.mrb[8].mxu1 }
 0x16d   : > { %v1300_v8 = vpop.f32.mrb[9].mxu1  ;;  %v1067_v4 = vrot.slane %v1062_v62, %v1066_v61 }
 0x16e   : > { %v534_v9 = vpop.f32.mrb[10].mxu1 }
 0x16f   : > { %v1301_v10 = vpop.f32.mrb[11].mxu1 }
 0x170   : > { %v479_v11 = vpop.f32.mrb[8].mxu0 }
 0x171   : > { %v485_v12 = vadd.f32 %v479_v11, %v433_v5  ;;  %v1292_v13 = vpop.f32.mrb[9].mxu0 }
 0x172   : > { %v482_v14 = vpop.f32.mrb[10].mxu0 }
 0x173   : > { %v537_v15 = vadd.f32 %v531_v7, %v485_v12  ;;  %v1293_v16 = vpop.f32.mrb[11].mxu0 }
 0x174   : > { %v635_v17 = vpop.f32.mrb[12].mxu1 }
 0x175   : > { %v1316_v18 = vpop.f32.mrb[13].mxu1 }
 0x176   : > { %v638_v19 = vpop.f32.mrb[14].mxu1 }
 0x177   : > { %v1317_v20 = vpop.f32.mrb[15].mxu1 }
 0x178   : > { %v583_v21 = vpop.f32.mrb[12].mxu0 }
 0x179   : > { %v589_v22 = vadd.f32 %v583_v21, %v537_v15  ;;  %v1308_v23 = vpop.f32.mrb[13].mxu0 }
 0x17a   : > { %v586_v24 = vpop.f32.mrb[14].mxu0 }
 0x17b   : > { %v641_v25 = vadd.f32 %v635_v17, %v589_v22  ;;  %v1309_v26 = vpop.f32.mrb[15].mxu0 }
 0x17c   : > { %v739_v27 = vpop.f32.mrb[16].mxu1 }
 0x17d   : > { %v1332_v28 = vpop.f32.mrb[17].mxu1 }
 0x17e   : > { %v742_v29 = vpop.f32.mrb[18].mxu1 }
 0x17f   : > { %v1333_v30 = vpop.f32.mrb[19].mxu1 }
 0x180   : > { %v687_v31 = vpop.f32.mrb[16].mxu0 }
 0x181   : > { %v693_v32 = vadd.f32 %v687_v31, %v641_v25  ;;  %v1324_v33 = vpop.f32.mrb[17].mxu0 }
 0x182   : > { %v690_v34 = vpop.f32.mrb[18].mxu0 }
 0x183   : > { %v745_v35 = vadd.f32 %v739_v27, %v693_v32  ;;  %v1325_v36 = vpop.f32.mrb[19].mxu0 }
 0x184   : > { %v843_v37 = vpop.f32.mrb[20].mxu1 }
 0x185   : > { %v1348_v38 = vpop.f32.mrb[21].mxu1 }
 0x186   : > { %v846_v39 = vpop.f32.mrb[22].mxu1 }
 0x187   : > { %v1349_v40 = vpop.f32.mrb[23].mxu1 }
 0x188   : > { %v791_v41 = vpop.f32.mrb[20].mxu0 }
 0x189   : > { %v797_v42 = vadd.f32 %v791_v41, %v745_v35  ;;  %v1340_v43 = vpop.f32.mrb[21].mxu0 }
 0x18a   : > { %v794_v44 = vpop.f32.mrb[22].mxu0 }
 0x18b   : > { %v849_v45 = vadd.f32 %v843_v37, %v797_v42  ;;  %v1341_v46 = vpop.f32.mrb[23].mxu0 }
 0x18c   : > { %v947_v47 = vpop.f32.mrb[24].mxu1 }
 0x18d   : > { %v1364_v48 = vpop.f32.mrb[25].mxu1 }
 0x18e   : > { %v950_v50 = vpop.f32.mrb[26].mxu1 }
 0x18f   : > { %v1365_v51 = vpop.f32.mrb[27].mxu1 }
 0x190   : > { %v895_v52 = vpop.f32.mrb[24].mxu0 }
 0x191   : > { %v901_v53 = vadd.f32 %v895_v52, %v849_v45  ;;  %v1356_v54 = vpop.f32.mrb[25].mxu0 }
 0x192   : > { %v898_v56 = vpop.f32.mrb[26].mxu0 }
 0x193   : > { %v953_v57 = vadd.f32 %v947_v47, %v901_v53  ;;  %v1357_v58 = vpop.f32.mrb[27].mxu0 }
 0x194   : > { %v1051_v59 = vpop.f32.mrb[28].mxu1 }
 0x195   : > { %v1380_v60 = vpop.f32.mrb[29].mxu1 }
 0x196   : > { %v1054_v63 = vpop.f32.mrb[30].mxu1 }
 0x197   : > { %v1381_v0 = vpop.f32.mrb[31].mxu1 }
 0x198   : > { %v999_v1 = vpop.f32.mrb[28].mxu0 }
 0x199   : > { %v1005_v2 = vadd.f32 %v999_v1, %v953_v57  ;;  %v1372_v3 = vpop.f32.mrb[29].mxu0 }
 0x19a   : > { %v1002_v5 = vpop.f32.mrb[30].mxu0 }
 0x19b   : > { %v1057_v6 = vadd.f32 %v1051_v59, %v1005_v2  ;;  %v1373_v7 = vpop.f32.mrb[31].mxu0 }
 0x19d   : > { %v1068_v8 = vadd.f32 %v1067_v4, %v1057_v6 }
 0x19f   : > { %1070 = vst.msk [vmem:[%s216_s22] sm:$0x1] %vm1069_vm2, %v1068_v8 }
 0x1a0 PF: > { %s15_s16 = sadd.s32 1, %s1449_s16   ;;  %s1661_s14 = smov %s1445_s15 }
 0x1a1   : > { %p12_p5 = scmp.ge.s32.totalorder %s15_s16, 4   ;;  %s1662_s15 = smov %s1664_s2 }
 0x1a3   :  { %14 = sbr.rel (!%p12_p5) target bundleno = 3 (0x3), region = 83 }

</bundles_post_ra>
